<compile_context>
chip_gen: v7x
topology: tpu7x:2x2x1
jax: 0.10.0
libtpu: 0.0.40
codegen_flags: <defaults>
</compile_context>

<pallas_src>
import math
from functools import partial

import jax
import jax.numpy as jnp
from jax.experimental import pallas as pl
from jax.experimental.pallas import tpu as pltpu

# Matmul / activation dtype (accumulation stays fp32 everywhere).
COMPUTE_DTYPE = jnp.bfloat16


def _round_up(x, m):
    return ((x + m - 1) // m) * m


def _select_tiling():
    """Pick tile prefs + VMEM budget from the detected part.

    128 MiB parts (v5e/v6e): big tiles (~85% HBM roofline) + high cap.
    64 MiB parts (v7x):      conservative tiles, 48 MiB cap.
    """
    try:
        vmem = pltpu.get_tpu_info().vmem_capacity_bytes
    except Exception:
        vmem = 64 * 1024 * 1024
    if vmem >= 96 * 1024 * 1024:
        return 512, 1024, 512, 96 * 1024 * 1024
    return 256, 512, 512, 48 * 1024 * 1024


TM_PREF, TN_PREF, TK_PREF, VMEM_LIMIT_BYTES = _select_tiling()

_COMPILER_MM3 = pltpu.CompilerParams(
    dimension_semantics=("parallel", "parallel", "arbitrary"),
    vmem_limit_bytes=VMEM_LIMIT_BYTES)
_COMPILER_MM2 = pltpu.CompilerParams(
    dimension_semantics=("parallel", "arbitrary"),
    vmem_limit_bytes=VMEM_LIMIT_BYTES)
_COMPILER_ATTN = pltpu.CompilerParams(
    dimension_semantics=("parallel", "parallel"),
    vmem_limit_bytes=VMEM_LIMIT_BYTES)


# --------------------------- tiled linear kernels ---------------------------

def _mm_bias_kernel(x_ref, w_ref, b_ref, o_ref, acc_ref, *, relu):
    @pl.when(pl.program_id(2) == 0)
    def _():
        acc_ref[...] = jnp.zeros_like(acc_ref)

    acc_ref[...] += jnp.dot(x_ref[...], w_ref[...],
                            preferred_element_type=jnp.float32)

    @pl.when(pl.program_id(2) == pl.num_programs(2) - 1)
    def _():
        y = acc_ref[...] + b_ref[...]
        if relu:
            y = jnp.maximum(y, 0.0)
        o_ref[...] = y.astype(o_ref.dtype)


def _mm_bias_res_ln_kernel(x_ref, w_ref, b_ref, r_ref, g_ref, bt_ref,
                           o_ref, acc_ref, *, eps):
    @pl.when(pl.program_id(2) == 0)
    def _():
        acc_ref[...] = jnp.zeros_like(acc_ref)

    acc_ref[...] += jnp.dot(x_ref[...], w_ref[...],
                            preferred_element_type=jnp.float32)

    @pl.when(pl.program_id(2) == pl.num_programs(2) - 1)
    def _():
        # bias + residual + LayerNorm (biased variance, eps=1e-12) fused into
        # the last K-step; rsqrt goes to the EUP instead of a VALU div+sqrt.
        y = acc_ref[...] + b_ref[...] + r_ref[...].astype(jnp.float32)
        mean = jnp.mean(y, axis=-1, keepdims=True)
        var = jnp.mean(jnp.square(y - mean), axis=-1, keepdims=True)
        yn = (y - mean) * jax.lax.rsqrt(var + eps)
        o_ref[...] = (yn * g_ref[...] + bt_ref[...]).astype(o_ref.dtype)


def linear_fused(x2d, w, b, *, relu=False, residual=None, ln=None,
                 eps=1e-12, out_dtype=None):
    """Tiled y = x @ w + b with optional fused ReLU or residual + LayerNorm."""
    if out_dtype is None:
        out_dtype = COMPUTE_DTYPE
    M, K = x2d.shape
    N = w.shape[1]

    # Full-extent blocks whenever a dim fits in one tile -> no runtime pad/slice.
    tm = M if M <= TM_PREF else TM_PREF
    tk = K if K <= TK_PREF else TK_PREF
    if ln is not None:
        tn = N  # LayerNorm epilogue needs the whole (un-padded) feature row
        # TODO(synk): on v7x with very large N, split LN into a second kernel so
        # tn can stay at TN_PREF and the (tm, N) blocks don't pressure 64 MiB VMEM.
    else:
        tn = N if N <= TN_PREF else TN_PREF

    Mp, Kp, Np = _round_up(M, tm), _round_up(K, tk), _round_up(N, tn)

    xp = x2d if (Mp == M and Kp == K) else jnp.pad(x2d, ((0, Mp - M), (0, Kp - K)))
    wp = w if (Kp == K and Np == N) else jnp.pad(w, ((0, Kp - K), (0, Np - N)))
    bp = (b if Np == N else jnp.pad(b, (0, Np - N))).reshape(1, Np).astype(jnp.float32)

    xp = xp.astype(COMPUTE_DTYPE)
    wp = wp.astype(COMPUTE_DTYPE)

    grid = (Mp // tm, Np // tn, Kp // tk)

    x_spec = pl.BlockSpec((tm, tk), lambda i, j, k: (i, k))
    w_spec = pl.BlockSpec((tk, tn), lambda i, j, k: (k, j))
    vec_spec = pl.BlockSpec((1, tn), lambda i, j, k: (0, j))
    mn_spec = pl.BlockSpec((tm, tn), lambda i, j, k: (i, j))

    if ln is None:
        out = pl.pallas_call(
            partial(_mm_bias_kernel, relu=relu),
            grid=grid,
            in_specs=[x_spec, w_spec, vec_spec],
            out_specs=mn_spec,
            out_shape=jax.ShapeDtypeStruct((Mp, Np), out_dtype),
            scratch_shapes=[pltpu.VMEM((tm, tn), jnp.float32)],
            compiler_params=_COMPILER_MM3,
        )(xp, wp, bp)
    else:
        assert residual is not None
        gamma, beta = ln
        rp = residual if Mp == M else jnp.pad(residual, ((0, Mp - M), (0, 0)))
        rp = rp.astype(COMPUTE_DTYPE)
        out = pl.pallas_call(
            partial(_mm_bias_res_ln_kernel, eps=eps),
            grid=grid,
            in_specs=[x_spec, w_spec, vec_spec, mn_spec, vec_spec, vec_spec],
            out_specs=mn_spec,
            out_shape=jax.ShapeDtypeStruct((Mp, Np), out_dtype),
            scratch_shapes=[pltpu.VMEM((tm, tn), jnp.float32)],
            compiler_params=_COMPILER_MM3,
        )(xp, wp, bp, rp,
          gamma.reshape(1, N).astype(jnp.float32),
          beta.reshape(1, N).astype(jnp.float32))

    if Mp != M or Np != N:
        out = out[:M, :N]
    return out


# ------------------- fused multi-output projection (QKV / KV) ---------------

def _multi_proj_kernel(*refs, n_out):
    x_ref = refs[0]
    ws = refs[1:1 + n_out]
    bs = refs[1 + n_out:1 + 2 * n_out]
    outs = refs[1 + 2 * n_out:1 + 3 * n_out]
    accs = refs[1 + 3 * n_out:]

    @pl.when(pl.program_id(1) == 0)
    def _():
        for a in accs:
            a[...] = jnp.zeros_like(a)

    x = x_ref[...]  # loaded once, reused for every head-projection
    for w_ref, a in zip(ws, accs):
        a[...] += jnp.dot(x, w_ref[...], preferred_element_type=jnp.float32)

    @pl.when(pl.program_id(1) == pl.num_programs(1) - 1)
    def _():
        for b_ref, o_ref, a in zip(bs, outs, accs):
            o_ref[...] = (a[...] + b_ref[...]).astype(o_ref.dtype)


def multi_linear(x2d, ws, bs):
    """x @ w_i + b_i for several weights in one kernel (multi-output pallas_call)."""
    n_out = len(ws)
    M, K = x2d.shape
    N = ws[0].shape[1]

    tm = M if M <= TM_PREF else TM_PREF
    tk = K if K <= TK_PREF else TK_PREF
    Mp, Kp = _round_up(M, tm), _round_up(K, tk)

    xp = x2d if (Mp == M and Kp == K) else jnp.pad(x2d, ((0, Mp - M), (0, Kp - K)))
    xp = xp.astype(COMPUTE_DTYPE)
    wsp = [(w if Kp == K else jnp.pad(w, ((0, Kp - K), (0, 0)))).astype(COMPUTE_DTYPE)
           for w in ws]
    bsp = [b.reshape(1, N).astype(jnp.float32) for b in bs]

    grid = (Mp // tm, Kp // tk)
    x_spec = pl.BlockSpec((tm, tk), lambda i, k: (i, k))
    w_spec = pl.BlockSpec((tk, N), lambda i, k: (k, 0))
    b_spec = pl.BlockSpec((1, N), lambda i, k: (0, 0))
    o_spec = pl.BlockSpec((tm, N), lambda i, k: (i, 0))

    outs = pl.pallas_call(
        partial(_multi_proj_kernel, n_out=n_out),
        grid=grid,
        in_specs=[x_spec] + [w_spec] * n_out + [b_spec] * n_out,
        out_specs=[o_spec for _ in range(n_out)],
        out_shape=[jax.ShapeDtypeStruct((Mp, N), COMPUTE_DTYPE) for _ in range(n_out)],
        scratch_shapes=[pltpu.VMEM((tm, N), jnp.float32) for _ in range(n_out)],
        compiler_params=_COMPILER_MM2,
    )(xp, *wsp, *bsp)

    if Mp != M:
        outs = tuple(o[:M] for o in outs)
    return tuple(outs)


# ----------------------- scaled-dot-product attention ----------------------

def _sdpa_kernel(q_ref, k_ref, v_ref, qv_ref, kv_ref, o_ref, *, scale, causal):
    # One (batch, head) pair per grid step: clean (L, dh) tiles, no lane slices.
    q = q_ref[...] * scale              # fold 1/sqrt(dh) into the (Lq, dh) operand
    k = k_ref[...]
    v = v_ref[...]
    Lq, Lk = q.shape[0], k.shape[0]

    s = jax.lax.dot_general(q, k, (((1,), (1,)), ((), ())),
                            preferred_element_type=jnp.float32)   # (Lq, Lk) fp32

    # Rebuild pad/causal mask from tiny per-token flags (no (B,Lq,Lk) mask DMA).
    valid = qv_ref[...] * kv_ref[...]   # (Lq,1) * (1,Lk) -> (Lq, Lk)
    if causal:
        row = jax.lax.broadcasted_iota(jnp.int32, (Lq, Lk), 0)
        col = jax.lax.broadcasted_iota(jnp.int32, (Lq, Lk), 1)
        valid = valid * (row >= col).astype(valid.dtype)
    s = jnp.where(valid > 0.0, s, jnp.float32(-10000.0))  # matches masked_fill

    s = s - jnp.max(s, axis=-1, keepdims=True)
    p = jnp.exp(s)
    p = p * pl.reciprocal(jnp.sum(p, axis=-1, keepdims=True), approx=True)
    o = jnp.dot(p.astype(v.dtype), v, preferred_element_type=jnp.float32)
    o_ref[...] = o.astype(o_ref.dtype)


def sdpa(q, k, v, q_valid, kv_valid, *, causal):
    """q/k/v: (B, H, L, dh) head-major; q_valid: (B, Lq, 1); kv_valid: (B, 1, Lk)."""
    B, H, Lq, dh = q.shape
    Lk = k.shape[2]
    scale = 1.0 / math.sqrt(dh)

    # TODO(synk): for long sequences convert to a flash-style online-softmax loop
    # over Lk blocks (matters first on v7x's 64 MiB VMEM); here K/V fit easily.
    def head_spec(L):
        return pl.BlockSpec((pl.Squeezed(), pl.Squeezed(), L, dh),
                            lambda b, h: (b, h, 0, 0))

    return pl.pallas_call(
        partial(_sdpa_kernel, scale=scale, causal=causal),
        grid=(B, H),
        in_specs=[
            head_spec(Lq), head_spec(Lk), head_spec(Lk),
            pl.BlockSpec((pl.Squeezed(), Lq, 1), lambda b, h: (b, 0, 0)),
            pl.BlockSpec((pl.Squeezed(), 1, Lk), lambda b, h: (b, 0, 0)),
        ],
        out_specs=head_spec(Lq),
        out_shape=jax.ShapeDtypeStruct((B, H, Lq, dh), COMPUTE_DTYPE),
        compiler_params=_COMPILER_ATTN,
    )(q, k, v, q_valid, kv_valid)


# ------------------------------ model glue --------------------------------

def multi_head_attention(xq, xkv, q_valid, kv_valid, p, n_head, causal, ln_p):
    B, Lq, D = xq.shape
    dh = D // n_head
    xq2 = xq.reshape(B * Lq, D)

    if xkv is xq:
        # Self-attention: x loaded once, 3 dots, 3 separate outputs (no slicing).
        q2, k2, v2 = multi_linear(xq2, [p["wq"], p["wk"], p["wv"]],
                                  [p["bq"], p["bk"], p["bv"]])
        Lkv = Lq
    else:
        # Cross-attention: Q from decoder state, fused K/V from encoder memory.
        Lkv = xkv.shape[1]
        xkv2 = xkv.reshape(B * Lkv, D)
        q2 = linear_fused(xq2, p["wq"], p["bq"])
        k2, v2 = multi_linear(xkv2, [p["wk"], p["wv"]], [p["bk"], p["bv"]])

    # Head-major (B, H, L, dh): each attention grid step sees whole per-head
    # tiles, so no lane relayouts inside the kernel and no final concat.
    def to_heads(t, L):
        return t.reshape(B, L, n_head, dh).transpose(0, 2, 1, 3)

    ctx = sdpa(to_heads(q2, Lq), to_heads(k2, Lkv), to_heads(v2, Lkv),
               q_valid, kv_valid, causal=causal)            # (B, H, Lq, dh)
    ctx2 = ctx.transpose(0, 2, 1, 3).reshape(B * Lq, D)

    # Output projection with residual-add + LayerNorm fused into the epilogue.
    out = linear_fused(ctx2, p["wo"], p["bo"], residual=xq2,
                       ln=(ln_p["g"], ln_p["b"]))
    return out.reshape(B, Lq, D)


def ffn_block(x, p, ln_p):
    B, L, D = x.shape
    x2 = x.reshape(B * L, D)
    h = linear_fused(x2, p["w1"], p["b1"], relu=True)
    y = linear_fused(h, p["w2"], p["b2"], residual=x2, ln=(ln_p["g"], ln_p["b"]))
    return y.reshape(B, L, D)


def positional_encoding(max_len, d_model):
    pos = jnp.arange(max_len, dtype=jnp.float32)[:, None]
    _2i = jnp.arange(0, d_model, 2, dtype=jnp.float32)
    angle = pos / jnp.power(10000.0, _2i / d_model)
    pe = jnp.zeros((max_len, d_model), jnp.float32)
    pe = pe.at[:, 0::2].set(jnp.sin(angle))
    pe = pe.at[:, 1::2].set(jnp.cos(angle))
    return pe


def encoder(src, src_nonpad, params, n_head):
    B, Ls = src.shape
    # TODO(synk): embedding gather has no clean rectangular BlockSpec; done in JAX.
    x = (params["enc_emb"][src] + params["pe"][:Ls]).astype(COMPUTE_DTYPE)
    q_valid = jnp.ones((B, Ls, 1), jnp.float32)        # src_mask only masks keys
    kv_valid = src_nonpad.reshape(B, 1, Ls)
    for lp in params["enc_layers"]:
        x = multi_head_attention(x, x, q_valid, kv_valid, lp["attn"],
                                 n_head, False, lp["ln1"])
        x = ffn_block(x, lp["ffn"], lp["ln2"])
    return x


def decoder(trg, enc_src, trg_nonpad, src_nonpad, params, n_head):
    B, Lt = trg.shape
    Ls = enc_src.shape[1]
    x = (params["dec_emb"][trg] + params["pe"][:Lt]).astype(COMPUTE_DTYPE)
    ones_q = jnp.ones((B, Lt, 1), jnp.float32)
    ones_kv = jnp.ones((B, 1, Lt), jnp.float32)
    q_valid_self = trg_nonpad.reshape(B, Lt, 1)          # trg_mask: pad on query rows
    kv_valid_cross = src_nonpad.reshape(B, 1, Ls)        # src_mask: pad on keys
    for lp in params["dec_layers"]:
        x = multi_head_attention(x, x, q_valid_self, ones_kv, lp["self_attn"],
                                 n_head, True, lp["ln1"])
        x = multi_head_attention(x, enc_src, ones_q, kv_valid_cross,
                                 lp["cross_attn"], n_head, False, lp["ln2"])
        x = ffn_block(x, lp["ffn"], lp["ln3"])
    B, Lt, D = x.shape
    # Final vocab projection in fp32 logits.
    logits = linear_fused(x.reshape(B * Lt, D), params["out"]["w"],
                          params["out"]["b"], out_dtype=jnp.float32)
    return logits.reshape(B, Lt, -1)


def transformer_forward(src, trg, params, n_head, src_pad_idx, trg_pad_idx):
    src_nonpad = (src != src_pad_idx).astype(jnp.float32)
    trg_nonpad = (trg != trg_pad_idx).astype(jnp.float32)
    enc_src = encoder(src, src_nonpad, params, n_head)
    return decoder(trg, enc_src, trg_nonpad, src_nonpad, params, n_head)


# --------------------------- parameter creation ----------------------------

def init_params(key, *, enc_voc, dec_voc, d_model, n_head, ffn_hidden,
                n_layers, max_len):
    keys = iter(jax.random.split(key, 256))

    def w(shape):   # matmul weights stored directly in the compute dtype (bf16)
        return (jax.random.normal(next(keys), shape, jnp.float32) * 0.02
                ).astype(COMPUTE_DTYPE)

    def wf32(shape):
        return jax.random.normal(next(keys), shape, jnp.float32) * 0.02

    def mha():
        z = lambda: jnp.zeros((d_model,), jnp.float32)
        return {"wq": w((d_model, d_model)), "bq": z(),
                "wk": w((d_model, d_model)), "bk": z(),
                "wv": w((d_model, d_model)), "bv": z(),
                "wo": w((d_model, d_model)), "bo": z()}

    def ln():
        return {"g": jnp.ones((d_model,), jnp.float32),
                "b": jnp.zeros((d_model,), jnp.float32)}

    def ffn_p():
        return {"w1": w((d_model, ffn_hidden)),
                "b1": jnp.zeros((ffn_hidden,), jnp.float32),
                "w2": w((ffn_hidden, d_model)),
                "b2": jnp.zeros((d_model,), jnp.float32)}

    enc_emb = wf32((enc_voc, d_model)).at[1].set(0.0)   # padding_idx=1
    dec_emb = wf32((dec_voc, d_model)).at[1].set(0.0)

    return {
        "enc_emb": enc_emb,
        "dec_emb": dec_emb,
        "pe": positional_encoding(max_len, d_model),
        "enc_layers": [{"attn": mha(), "ln1": ln(), "ffn": ffn_p(), "ln2": ln()}
                       for _ in range(n_layers)],
        "dec_layers": [{"self_attn": mha(), "ln1": ln(),
                        "cross_attn": mha(), "ln2": ln(),
                        "ffn": ffn_p(), "ln3": ln()}
                       for _ in range(n_layers)],
        "out": {"w": w((d_model, dec_voc)),
                "b": jnp.zeros((dec_voc,), jnp.float32)},
    }


# --------------------------------- main ------------------------------------

if __name__ == "__main__":
    B, Ls, Lt = 2, 8, 8
    d_model, n_head, ffn_hidden, n_layers, max_len = 32, 4, 64, 2, 16
    enc_voc, dec_voc = 16, 16
    src_pad_idx = trg_pad_idx = 1
    trg_sos_idx = 2

    key = jax.random.PRNGKey(0)
    k_param, k_src, k_trg = jax.random.split(key, 3)

    params = init_params(k_param, enc_voc=enc_voc, dec_voc=dec_voc,
                         d_model=d_model, n_head=n_head, ffn_hidden=ffn_hidden,
                         n_layers=n_layers, max_len=max_len)

    src = jax.random.randint(k_src, (B, Ls), 2, enc_voc, dtype=jnp.int32)
    trg = jax.random.randint(k_trg, (B, Lt), 2, dec_voc, dtype=jnp.int32)
    src = src.at[0, -2:].set(src_pad_idx)    # some padding tokens
    trg = trg.at[1, -3:].set(trg_pad_idx)
    trg = trg.at[:, 0].set(trg_sos_idx)

    fwd = jax.jit(lambda s, t: transformer_forward(
        s, t, params, n_head, src_pad_idx, trg_pad_idx))

    out = jax.block_until_ready(fwd(src, trg))
    assert out.shape == (B, Lt, dec_voc), out.shape
    assert bool(jnp.all(jnp.isfinite(out)))
    print("KERNEL_OK")
</pallas_src>

<mosaic_0001>
module attributes {stable_mosaic.version = 11 : i64} {
  func.func @_multi_proj_kernel(%arg0: i32, %arg1: i32, %arg2: memref<16x32xbf16, #tpu.memory_space<vmem>>, %arg3: memref<32x32xbf16, #tpu.memory_space<vmem>>, %arg4: memref<32x32xbf16, #tpu.memory_space<vmem>>, %arg5: memref<32x32xbf16, #tpu.memory_space<vmem>>, %arg6: memref<1x32xf32, #tpu.memory_space<vmem>>, %arg7: memref<1x32xf32, #tpu.memory_space<vmem>>, %arg8: memref<1x32xf32, #tpu.memory_space<vmem>>, %arg9: memref<16x32xbf16, #tpu.memory_space<vmem>>, %arg10: memref<16x32xbf16, #tpu.memory_space<vmem>>, %arg11: memref<16x32xbf16, #tpu.memory_space<vmem>>, %arg12: memref<16x32xf32, #tpu.memory_space<vmem>>, %arg13: memref<16x32xf32, #tpu.memory_space<vmem>>, %arg14: memref<16x32xf32, #tpu.memory_space<vmem>>) attributes {dimension_semantics = [#tpu.dimension_semantics<parallel>, #tpu.dimension_semantics<arbitrary>], iteration_bounds = array<i64: 1, 1>, scalar_prefetch = 0 : i64, scratch_operands = 3 : i64, tpu.core_type = #tpu.core_type<tc>, window_params = [{transform_indices = @transform_0, window_bounds = array<i64: 16, 32>}, {transform_indices = @transform_1, window_bounds = array<i64: 32, 32>}, {transform_indices = @transform_2, window_bounds = array<i64: 32, 32>}, {transform_indices = @transform_3, window_bounds = array<i64: 32, 32>}, {pipeline_mode = #tpu.pipeline_mode<synchronous>, transform_indices = @transform_4, window_bounds = array<i64: 1, 32>}, {pipeline_mode = #tpu.pipeline_mode<synchronous>, transform_indices = @transform_5, window_bounds = array<i64: 1, 32>}, {pipeline_mode = #tpu.pipeline_mode<synchronous>, transform_indices = @transform_6, window_bounds = array<i64: 1, 32>}, {transform_indices = @transform_7, window_bounds = array<i64: 16, 32>}, {transform_indices = @transform_8, window_bounds = array<i64: 16, 32>}, {transform_indices = @transform_9, window_bounds = array<i64: 16, 32>}]} {
    %c0_i32 = arith.constant 0 : i32
    %0 = arith.cmpi eq, %arg1, %c0_i32 : i32
    %1 = arith.extui %0 : i1 to i32
    %c0_i32_0 = arith.constant 0 : i32
    %2 = arith.cmpi ne, %1, %c0_i32_0 : i32
    scf.if %2 {
      %cst_24 = arith.constant 0.000000e+00 : f32
      %22 = vector.broadcast %cst_24 : f32 to vector<16x32xf32>
      %c0_25 = arith.constant 0 : index
      %c0_26 = arith.constant 0 : index
      %23 = vector.load %arg12[%c0_25, %c0_26] : memref<16x32xf32, #tpu.memory_space<vmem>>, vector<16x32xf32>
      tpu.vector_store %arg12[%c0_25, %c0_26], %22 {strides = array<i32>} : memref<16x32xf32, #tpu.memory_space<vmem>>, vector<16x32xf32>,
      %cst_27 = arith.constant 0.000000e+00 : f32
      %24 = vector.broadcast %cst_27 : f32 to vector<16x32xf32>
      %c0_28 = arith.constant 0 : index
      %c0_29 = arith.constant 0 : index
      %25 = vector.load %arg13[%c0_28, %c0_29] : memref<16x32xf32, #tpu.memory_space<vmem>>, vector<16x32xf32>
      tpu.vector_store %arg13[%c0_28, %c0_29], %24 {strides = array<i32>} : memref<16x32xf32, #tpu.memory_space<vmem>>, vector<16x32xf32>,
      %cst_30 = arith.constant 0.000000e+00 : f32
      %26 = vector.broadcast %cst_30 : f32 to vector<16x32xf32>
      %c0_31 = arith.constant 0 : index
      %c0_32 = arith.constant 0 : index
      %27 = vector.load %arg14[%c0_31, %c0_32] : memref<16x32xf32, #tpu.memory_space<vmem>>, vector<16x32xf32>
      tpu.vector_store %arg14[%c0_31, %c0_32], %26 {strides = array<i32>} : memref<16x32xf32, #tpu.memory_space<vmem>>, vector<16x32xf32>,
    } else {
    }
    %c0 = arith.constant 0 : index
    %c0_1 = arith.constant 0 : index
    %3 = vector.load %arg2[%c0, %c0_1] : memref<16x32xbf16, #tpu.memory_space<vmem>>, vector<16x32xbf16>
    %c0_2 = arith.constant 0 : index
    %c0_3 = arith.constant 0 : index
    %4 = vector.load %arg12[%c0_2, %c0_3] : memref<16x32xf32, #tpu.memory_space<vmem>>, vector<16x32xf32>
    %c0_4 = arith.constant 0 : index
    %c0_5 = arith.constant 0 : index
    %5 = vector.load %arg3[%c0_4, %c0_5] : memref<32x32xbf16, #tpu.memory_space<vmem>>, vector<32x32xbf16>
    %cst = arith.constant dense<0.000000e+00> : vector<16x32xf32>
    %6 = tpu.matmul %3, %5, %cst {dimension_numbers = #tpu.dot_dimension_numbers<[1], [0], [0], [1], [0, 0, 1, 1], [], []>} : vector<16x32xbf16>, vector<32x32xbf16>, vector<16x32xf32> -> vector<16x32xf32>
    %7 = arith.addf %4, %6 : vector<16x32xf32>
    %c0_6 = arith.constant 0 : index
    %c0_7 = arith.constant 0 : index
    %8 = vector.load %arg12[%c0_6, %c0_7] : memref<16x32xf32, #tpu.memory_space<vmem>>, vector<16x32xf32>
    tpu.vector_store %arg12[%c0_6, %c0_7], %7 {strides = array<i32>} : memref<16x32xf32, #tpu.memory_space<vmem>>, vector<16x32xf32>,
    %c0_8 = arith.constant 0 : index
    %c0_9 = arith.constant 0 : index
    %9 = vector.load %arg13[%c0_8, %c0_9] : memref<16x32xf32, #tpu.memory_space<vmem>>, vector<16x32xf32>
    %c0_10 = arith.constant 0 : index
    %c0_11 = arith.constant 0 : index
    %10 = vector.load %arg4[%c0_10, %c0_11] : memref<32x32xbf16, #tpu.memory_space<vmem>>, vector<32x32xbf16>
    %cst_12 = arith.constant dense<0.000000e+00> : vector<16x32xf32>
    %11 = tpu.matmul %3, %10, %cst_12 {dimension_numbers = #tpu.dot_dimension_numbers<[1], [0], [0], [1], [0, 0, 1, 1], [], []>} : vector<16x32xbf16>, vector<32x32xbf16>, vector<16x32xf32> -> vector<16x32xf32>
    %12 = arith.addf %9, %11 : vector<16x32xf32>
    %c0_13 = arith.constant 0 : index
    %c0_14 = arith.constant 0 : index
    %13 = vector.load %arg13[%c0_13, %c0_14] : memref<16x32xf32, #tpu.memory_space<vmem>>, vector<16x32xf32>
    tpu.vector_store %arg13[%c0_13, %c0_14], %12 {strides = array<i32>} : memref<16x32xf32, #tpu.memory_space<vmem>>, vector<16x32xf32>,
    %c0_15 = arith.constant 0 : index
    %c0_16 = arith.constant 0 : index
    %14 = vector.load %arg14[%c0_15, %c0_16] : memref<16x32xf32, #tpu.memory_space<vmem>>, vector<16x32xf32>
    %c0_17 = arith.constant 0 : index
    %c0_18 = arith.constant 0 : index
    %15 = vector.load %arg5[%c0_17, %c0_18] : memref<32x32xbf16, #tpu.memory_space<vmem>>, vector<32x32xbf16>
    %cst_19 = arith.constant dense<0.000000e+00> : vector<16x32xf32>
    %16 = tpu.matmul %3, %15, %cst_19 {dimension_numbers = #tpu.dot_dimension_numbers<[1], [0], [0], [1], [0, 0, 1, 1], [], []>} : vector<16x32xbf16>, vector<32x32xbf16>, vector<16x32xf32> -> vector<16x32xf32>
    %17 = arith.addf %14, %16 : vector<16x32xf32>
    %c0_20 = arith.constant 0 : index
    %c0_21 = arith.constant 0 : index
    %18 = vector.load %arg14[%c0_20, %c0_21] : memref<16x32xf32, #tpu.memory_space<vmem>>, vector<16x32xf32>
    tpu.vector_store %arg14[%c0_20, %c0_21], %17 {strides = array<i32>} : memref<16x32xf32, #tpu.memory_space<vmem>>, vector<16x32xf32>,
    %c0_i32_22 = arith.constant 0 : i32
    %19 = arith.cmpi eq, %arg1, %c0_i32_22 : i32
    %20 = arith.extui %19 : i1 to i32
    %c0_i32_23 = arith.constant 0 : i32
    %21 = arith.cmpi ne, %20, %c0_i32_23 : i32
    scf.if %21 {
      %c0_24 = arith.constant 0 : index
      %c0_25 = arith.constant 0 : index
      %22 = vector.load %arg12[%c0_24, %c0_25] : memref<16x32xf32, #tpu.memory_space<vmem>>, vector<16x32xf32>
      %c0_26 = arith.constant 0 : index
      %c0_27 = arith.constant 0 : index
      %23 = vector.load %arg6[%c0_26, %c0_27] : memref<1x32xf32, #tpu.memory_space<vmem>>, vector<1x32xf32>
      %24 = vector.broadcast %23 : vector<1x32xf32> to vector<16x32xf32>
      %25 = arith.addf %22, %24 : vector<16x32xf32>
      %26 = arith.truncf %25 : vector<16x32xf32> to vector<16x32xbf16>
      %c0_28 = arith.constant 0 : index
      %c0_29 = arith.constant 0 : index
      %27 = vector.load %arg9[%c0_28, %c0_29] : memref<16x32xbf16, #tpu.memory_space<vmem>>, vector<16x32xbf16>
      tpu.vector_store %arg9[%c0_28, %c0_29], %26 {strides = array<i32>} : memref<16x32xbf16, #tpu.memory_space<vmem>>, vector<16x32xbf16>,
      %c0_30 = arith.constant 0 : index
      %c0_31 = arith.constant 0 : index
      %28 = vector.load %arg13[%c0_30, %c0_31] : memref<16x32xf32, #tpu.memory_space<vmem>>, vector<16x32xf32>
      %c0_32 = arith.constant 0 : index
      %c0_33 = arith.constant 0 : index
      %29 = vector.load %arg7[%c0_32, %c0_33] : memref<1x32xf32, #tpu.memory_space<vmem>>, vector<1x32xf32>
      %30 = vector.broadcast %29 : vector<1x32xf32> to vector<16x32xf32>
      %31 = arith.addf %28, %30 : vector<16x32xf32>
      %32 = arith.truncf %31 : vector<16x32xf32> to vector<16x32xbf16>
      %c0_34 = arith.constant 0 : index
      %c0_35 = arith.constant 0 : index
      %33 = vector.load %arg10[%c0_34, %c0_35] : memref<16x32xbf16, #tpu.memory_space<vmem>>, vector<16x32xbf16>
      tpu.vector_store %arg10[%c0_34, %c0_35], %32 {strides = array<i32>} : memref<16x32xbf16, #tpu.memory_space<vmem>>, vector<16x32xbf16>,
      %c0_36 = arith.constant 0 : index
      %c0_37 = arith.constant 0 : index
      %34 = vector.load %arg14[%c0_36, %c0_37] : memref<16x32xf32, #tpu.memory_space<vmem>>, vector<16x32xf32>
      %c0_38 = arith.constant 0 : index
      %c0_39 = arith.constant 0 : index
      %35 = vector.load %arg8[%c0_38, %c0_39] : memref<1x32xf32, #tpu.memory_space<vmem>>, vector<1x32xf32>
      %36 = vector.broadcast %35 : vector<1x32xf32> to vector<16x32xf32>
      %37 = arith.addf %34, %36 : vector<16x32xf32>
      %38 = arith.truncf %37 : vector<16x32xf32> to vector<16x32xbf16>
      %c0_40 = arith.constant 0 : index
      %c0_41 = arith.constant 0 : index
      %39 = vector.load %arg11[%c0_40, %c0_41] : memref<16x32xbf16, #tpu.memory_space<vmem>>, vector<16x32xbf16>
      tpu.vector_store %arg11[%c0_40, %c0_41], %38 {strides = array<i32>} : memref<16x32xbf16, #tpu.memory_space<vmem>>, vector<16x32xbf16>,
    } else {
    }
    return
  }
  func.func @transform_0(%arg0: i32, %arg1: i32) -> (i32, i32) {
    %c0_i32 = arith.constant 0 : i32
    return %arg0, %arg1 : i32, i32
  }
  func.func @transform_1(%arg0: i32, %arg1: i32) -> (i32, i32) {
    %c0_i32 = arith.constant 0 : i32
    %c0_i32_0 = arith.constant 0 : i32
    return %arg1, %c0_i32 : i32, i32
  }
  func.func @transform_2(%arg0: i32, %arg1: i32) -> (i32, i32) {
    %c0_i32 = arith.constant 0 : i32
    %c0_i32_0 = arith.constant 0 : i32
    return %arg1, %c0_i32 : i32, i32
  }
  func.func @transform_3(%arg0: i32, %arg1: i32) -> (i32, i32) {
    %c0_i32 = arith.constant 0 : i32
    %c0_i32_0 = arith.constant 0 : i32
    return %arg1, %c0_i32 : i32, i32
  }
  func.func @transform_4(%arg0: i32, %arg1: i32) -> (i32, i32) {
    %c0_i32 = arith.constant 0 : i32
    %c0_i32_0 = arith.constant 0 : i32
    %c0_i32_1 = arith.constant 0 : i32
    return %c0_i32, %c0_i32_0 : i32, i32
  }
  func.func @transform_5(%arg0: i32, %arg1: i32) -> (i32, i32) {
    %c0_i32 = arith.constant 0 : i32
    %c0_i32_0 = arith.constant 0 : i32
    %c0_i32_1 = arith.constant 0 : i32
    return %c0_i32, %c0_i32_0 : i32, i32
  }
  func.func @transform_6(%arg0: i32, %arg1: i32) -> (i32, i32) {
    %c0_i32 = arith.constant 0 : i32
    %c0_i32_0 = arith.constant 0 : i32
    %c0_i32_1 = arith.constant 0 : i32
    return %c0_i32, %c0_i32_0 : i32, i32
  }
  func.func @transform_7(%arg0: i32, %arg1: i32) -> (i32, i32) {
    %c0_i32 = arith.constant 0 : i32
    %c0_i32_0 = arith.constant 0 : i32
    return %arg0, %c0_i32 : i32, i32
  }
  func.func @transform_8(%arg0: i32, %arg1: i32) -> (i32, i32) {
    %c0_i32 = arith.constant 0 : i32
    %c0_i32_0 = arith.constant 0 : i32
    return %arg0, %c0_i32 : i32, i32
  }
  func.func @transform_9(%arg0: i32, %arg1: i32) -> (i32, i32) {
    %c0_i32 = arith.constant 0 : i32
    %c0_i32_0 = arith.constant 0 : i32
    return %arg0, %c0_i32 : i32, i32
  }
}

module attributes {stable_mosaic.version = 11 : i64} {
  func.func @_mm_bias_res_ln_kernel(%arg0: i32, %arg1: i32, %arg2: i32, %arg3: memref<16x32xbf16, #tpu.memory_space<vmem>>, %arg4: memref<32x32xbf16, #tpu.memory_space<vmem>>, %arg5: memref<1x32xf32, #tpu.memory_space<vmem>>, %arg6: memref<16x32xbf16, #tpu.memory_space<vmem>>, %arg7: memref<1x32xf32, #tpu.memory_space<vmem>>, %arg8: memref<1x32xf32, #tpu.memory_space<vmem>>, %arg9: memref<16x32xbf16, #tpu.memory_space<vmem>>, %arg10: memref<16x32xf32, #tpu.memory_space<vmem>>) attributes {dimension_semantics = [#tpu.dimension_semantics<parallel>, #tpu.dimension_semantics<parallel>, #tpu.dimension_semantics<arbitrary>], iteration_bounds = array<i64: 1, 1, 1>, scalar_prefetch = 0 : i64, scratch_operands = 1 : i64, tpu.core_type = #tpu.core_type<tc>, window_params = [{transform_indices = @transform_0, window_bounds = array<i64: 16, 32>}, {transform_indices = @transform_1, window_bounds = array<i64: 32, 32>}, {transform_indices = @transform_2, window_bounds = array<i64: 1, 32>}, {transform_indices = @transform_3, window_bounds = array<i64: 16, 32>}, {transform_indices = @transform_4, window_bounds = array<i64: 1, 32>}, {transform_indices = @transform_5, window_bounds = array<i64: 1, 32>}, {transform_indices = @transform_6, window_bounds = array<i64: 16, 32>}]} {
    %c0_i32 = arith.constant 0 : i32
    %0 = arith.cmpi eq, %arg2, %c0_i32 : i32
    %1 = arith.extui %0 : i1 to i32
    %c0_i32_0 = arith.constant 0 : i32
    %2 = arith.cmpi ne, %1, %c0_i32_0 : i32
    scf.if %2 {
      %cst_10 = arith.constant 0.000000e+00 : f32
      %12 = vector.broadcast %cst_10 : f32 to vector<16x32xf32>
      %c0_11 = arith.constant 0 : index
      %c0_12 = arith.constant 0 : index
      %13 = vector.load %arg10[%c0_11, %c0_12] : memref<16x32xf32, #tpu.memory_space<vmem>>, vector<16x32xf32>
      tpu.vector_store %arg10[%c0_11, %c0_12], %12 {strides = array<i32>} : memref<16x32xf32, #tpu.memory_space<vmem>>, vector<16x32xf32>,
    } else {
    }
    %c0 = arith.constant 0 : index
    %c0_1 = arith.constant 0 : index
    %3 = vector.load %arg10[%c0, %c0_1] : memref<16x32xf32, #tpu.memory_space<vmem>>, vector<16x32xf32>
    %c0_2 = arith.constant 0 : index
    %c0_3 = arith.constant 0 : index
    %4 = vector.load %arg3[%c0_2, %c0_3] : memref<16x32xbf16, #tpu.memory_space<vmem>>, vector<16x32xbf16>
    %c0_4 = arith.constant 0 : index
    %c0_5 = arith.constant 0 : index
    %5 = vector.load %arg4[%c0_4, %c0_5] : memref<32x32xbf16, #tpu.memory_space<vmem>>, vector<32x32xbf16>
    %cst = arith.constant dense<0.000000e+00> : vector<16x32xf32>
    %6 = tpu.matmul %4, %5, %cst {dimension_numbers = #tpu.dot_dimension_numbers<[1], [0], [0], [1], [0, 0, 1, 1], [], []>} : vector<16x32xbf16>, vector<32x32xbf16>, vector<16x32xf32> -> vector<16x32xf32>
    %7 = arith.addf %3, %6 : vector<16x32xf32>
    %c0_6 = arith.constant 0 : index
    %c0_7 = arith.constant 0 : index
    %8 = vector.load %arg10[%c0_6, %c0_7] : memref<16x32xf32, #tpu.memory_space<vmem>>, vector<16x32xf32>
    tpu.vector_store %arg10[%c0_6, %c0_7], %7 {strides = array<i32>} : memref<16x32xf32, #tpu.memory_space<vmem>>, vector<16x32xf32>,
    %c0_i32_8 = arith.constant 0 : i32
    %9 = arith.cmpi eq, %arg2, %c0_i32_8 : i32
    %10 = arith.extui %9 : i1 to i32
    %c0_i32_9 = arith.constant 0 : i32
    %11 = arith.cmpi ne, %10, %c0_i32_9 : i32
    scf.if %11 {
      %c0_10 = arith.constant 0 : index
      %c0_11 = arith.constant 0 : index
      %12 = vector.load %arg10[%c0_10, %c0_11] : memref<16x32xf32, #tpu.memory_space<vmem>>, vector<16x32xf32>
      %c0_12 = arith.constant 0 : index
      %c0_13 = arith.constant 0 : index
      %13 = vector.load %arg5[%c0_12, %c0_13] : memref<1x32xf32, #tpu.memory_space<vmem>>, vector<1x32xf32>
      %14 = vector.broadcast %13 : vector<1x32xf32> to vector<16x32xf32>
      %15 = arith.addf %12, %14 : vector<16x32xf32>
      %c0_14 = arith.constant 0 : index
      %c0_15 = arith.constant 0 : index
      %16 = vector.load %arg6[%c0_14, %c0_15] : memref<16x32xbf16, #tpu.memory_space<vmem>>, vector<16x32xbf16>
      %17 = arith.extf %16 : vector<16x32xbf16> to vector<16x32xf32>
      %18 = arith.addf %15, %17 : vector<16x32xf32>
      %cst_16 = arith.constant dense<0.000000e+00> : vector<16xf32>
      %19 = vector.multi_reduction <add>, %18, %cst_16 [1] : vector<16x32xf32> to vector<16xf32>
      %20 = vector.shape_cast %19 : vector<16xf32> to vector<16x1xf32>
      %cst_17 = arith.constant 3.200000e+01 : f32
      %21 = vector.broadcast %cst_17 : f32 to vector<16x1xf32>
      %22 = arith.divf %20, %21 : vector<16x1xf32>
      %23 = vector.broadcast %22 : vector<16x1xf32> to vector<16x32xf32>
      %24 = arith.subf %18, %23 : vector<16x32xf32>
      %25 = arith.mulf %24, %24 : vector<16x32xf32>
      %cst_18 = arith.constant dense<0.000000e+00> : vector<16xf32>
      %26 = vector.multi_reduction <add>, %25, %cst_18 [1] : vector<16x32xf32> to vector<16xf32>
      %27 = vector.shape_cast %26 : vector<16xf32> to vector<16x1xf32>
      %cst_19 = arith.constant 3.200000e+01 : f32
      %28 = vector.broadcast %cst_19 : f32 to vector<16x1xf32>
      %29 = arith.divf %27, %28 : vector<16x1xf32>
      %30 = vector.broadcast %22 : vector<16x1xf32> to vector<16x32xf32>
      %31 = arith.subf %18, %30 : vector<16x32xf32>
      %cst_20 = arith.constant 9.99999996E-13 : f32
      %32 = vector.broadcast %cst_20 : f32 to vector<16x1xf32>
      %33 = arith.addf %29, %32 : vector<16x1xf32>
      %34 = math.rsqrt %33 : vector<16x1xf32>
      %35 = vector.broadcast %34 : vector<16x1xf32> to vector<16x32xf32>
      %36 = arith.mulf %31, %35 : vector<16x32xf32>
      %c0_21 = arith.constant 0 : index
      %c0_22 = arith.constant 0 : index
      %37 = vector.load %arg7[%c0_21, %c0_22] : memref<1x32xf32, #tpu.memory_space<vmem>>, vector<1x32xf32>
      %38 = vector.broadcast %37 : vector<1x32xf32> to vector<16x32xf32>
      %39 = arith.mulf %36, %38 : vector<16x32xf32>
      %c0_23 = arith.constant 0 : index
      %c0_24 = arith.constant 0 : index
      %40 = vector.load %arg8[%c0_23, %c0_24] : memref<1x32xf32, #tpu.memory_space<vmem>>, vector<1x32xf32>
      %41 = vector.broadcast %40 : vector<1x32xf32> to vector<16x32xf32>
      %42 = arith.addf %39, %41 : vector<16x32xf32>
      %43 = arith.truncf %42 : vector<16x32xf32> to vector<16x32xbf16>
      %c0_25 = arith.constant 0 : index
      %c0_26 = arith.constant 0 : index
      %44 = vector.load %arg9[%c0_25, %c0_26] : memref<16x32xbf16, #tpu.memory_space<vmem>>, vector<16x32xbf16>
      tpu.vector_store %arg9[%c0_25, %c0_26], %43 {strides = array<i32>} : memref<16x32xbf16, #tpu.memory_space<vmem>>, vector<16x32xbf16>,
    } else {
    }
    return
  }
  func.func @transform_0(%arg0: i32, %arg1: i32, %arg2: i32) -> (i32, i32) {
    %c0_i32 = arith.constant 0 : i32
    return %arg0, %arg2 : i32, i32
  }
  func.func @transform_1(%arg0: i32, %arg1: i32, %arg2: i32) -> (i32, i32) {
    %c0_i32 = arith.constant 0 : i32
    return %arg2, %arg1 : i32, i32
  }
  func.func @transform_2(%arg0: i32, %arg1: i32, %arg2: i32) -> (i32, i32) {
    %c0_i32 = arith.constant 0 : i32
    %c0_i32_0 = arith.constant 0 : i32
    return %c0_i32, %arg1 : i32, i32
  }
  func.func @transform_3(%arg0: i32, %arg1: i32, %arg2: i32) -> (i32, i32) {
    %c0_i32 = arith.constant 0 : i32
    return %arg0, %arg1 : i32, i32
  }
  func.func @transform_4(%arg0: i32, %arg1: i32, %arg2: i32) -> (i32, i32) {
    %c0_i32 = arith.constant 0 : i32
    %c0_i32_0 = arith.constant 0 : i32
    return %c0_i32, %arg1 : i32, i32
  }
  func.func @transform_5(%arg0: i32, %arg1: i32, %arg2: i32) -> (i32, i32) {
    %c0_i32 = arith.constant 0 : i32
    %c0_i32_0 = arith.constant 0 : i32
    return %c0_i32, %arg1 : i32, i32
  }
  func.func @transform_6(%arg0: i32, %arg1: i32, %arg2: i32) -> (i32, i32) {
    %c0_i32 = arith.constant 0 : i32
    return %arg0, %arg1 : i32, i32
  }
}

module attributes {stable_mosaic.version = 11 : i64} {
  func.func @_sdpa_kernel(%arg0: i32, %arg1: i32, %arg2: memref<1x1x8x8xbf16, #tpu.memory_space<vmem>>, %arg3: memref<1x1x8x8xbf16, #tpu.memory_space<vmem>>, %arg4: memref<1x1x8x8xbf16, #tpu.memory_space<vmem>>, %arg5: memref<1x8x1xf32, #tpu.memory_space<vmem>>, %arg6: memref<1x1x8xf32, #tpu.memory_space<vmem>>, %arg7: memref<1x1x8x8xbf16, #tpu.memory_space<vmem>>) attributes {dimension_semantics = [#tpu.dimension_semantics<parallel>, #tpu.dimension_semantics<parallel>], iteration_bounds = array<i64: 2, 4>, scalar_prefetch = 0 : i64, scratch_operands = 0 : i64, tpu.core_type = #tpu.core_type<tc>, window_params = [{transform_indices = @transform_0, window_bounds = array<i64: 1, 1, 8, 8>}, {transform_indices = @transform_1, window_bounds = array<i64: 1, 1, 8, 8>}, {transform_indices = @transform_2, window_bounds = array<i64: 1, 1, 8, 8>}, {transform_indices = @transform_3, window_bounds = array<i64: 1, 8, 1>}, {transform_indices = @transform_4, window_bounds = array<i64: 1, 1, 8>}, {transform_indices = @transform_5, window_bounds = array<i64: 1, 1, 8, 8>}]} {
    %c0 = arith.constant 0 : index
    %c0_0 = arith.constant 0 : index
    %c0_1 = arith.constant 0 : index
    %c0_2 = arith.constant 0 : index
    %0 = vector.load %arg2[%c0, %c0_0, %c0_1, %c0_2] : memref<1x1x8x8xbf16, #tpu.memory_space<vmem>>, vector<1x1x8x8xbf16>
    %1 = vector.shape_cast %0 : vector<1x1x8x8xbf16> to vector<8x8xbf16>
    %cst = arith.constant 3.535160e-01 : bf16
    %2 = vector.broadcast %cst : bf16 to vector<8x8xbf16>
    %3 = arith.mulf %1, %2 : vector<8x8xbf16>
    %c0_3 = arith.constant 0 : index
    %c0_4 = arith.constant 0 : index
    %c0_5 = arith.constant 0 : index
    %c0_6 = arith.constant 0 : index
    %4 = vector.load %arg3[%c0_3, %c0_4, %c0_5, %c0_6] : memref<1x1x8x8xbf16, #tpu.memory_space<vmem>>, vector<1x1x8x8xbf16>
    %5 = vector.shape_cast %4 : vector<1x1x8x8xbf16> to vector<8x8xbf16>
    %c0_7 = arith.constant 0 : index
    %c0_8 = arith.constant 0 : index
    %c0_9 = arith.constant 0 : index
    %c0_10 = arith.constant 0 : index
    %6 = vector.load %arg4[%c0_7, %c0_8, %c0_9, %c0_10] : memref<1x1x8x8xbf16, #tpu.memory_space<vmem>>, vector<1x1x8x8xbf16>
    %7 = vector.shape_cast %6 : vector<1x1x8x8xbf16> to vector<8x8xbf16>
    %cst_11 = arith.constant dense<0.000000e+00> : vector<8x8xf32>
    %8 = tpu.matmul %3, %5, %cst_11 {dimension_numbers = #tpu.dot_dimension_numbers<[1], [1], [0], [0], [0, 0, 1, 0], [], []>} : vector<8x8xbf16>, vector<8x8xbf16>, vector<8x8xf32> -> vector<8x8xf32>
    %c0_12 = arith.constant 0 : index
    %c0_13 = arith.constant 0 : index
    %c0_14 = arith.constant 0 : index
    %9 = vector.load %arg5[%c0_12, %c0_13, %c0_14] : memref<1x8x1xf32, #tpu.memory_space<vmem>>, vector<1x8x1xf32>
    %10 = vector.shape_cast %9 : vector<1x8x1xf32> to vector<8x1xf32>
    %c0_15 = arith.constant 0 : index
    %c0_16 = arith.constant 0 : index
    %c0_17 = arith.constant 0 : index
    %11 = vector.load %arg6[%c0_15, %c0_16, %c0_17] : memref<1x1x8xf32, #tpu.memory_space<vmem>>, vector<1x1x8xf32>
    %12 = vector.shape_cast %11 : vector<1x1x8xf32> to vector<1x8xf32>
    %13 = vector.broadcast %10 : vector<8x1xf32> to vector<8x8xf32>
    %14 = vector.broadcast %12 : vector<1x8xf32> to vector<8x8xf32>
    %15 = arith.mulf %13, %14 : vector<8x8xf32>
    %16 = tpu.iota {dimensions = array<i32: 0>} : vector<8x8xi32>
    %17 = tpu.iota {dimensions = array<i32: 1>} : vector<8x8xi32>
    %18 = arith.cmpi sge, %16, %17 : vector<8x8xi32>
    %19 = arith.extui %18 : vector<8x8xi1> to vector<8x8xi32>
    %20 = arith.sitofp %19 : vector<8x8xi32> to vector<8x8xf32>
    %21 = arith.mulf %15, %20 : vector<8x8xf32>
    %cst_18 = arith.constant 0.000000e+00 : f32
    %22 = vector.broadcast %cst_18 : f32 to vector<8x8xf32>
    %23 = arith.cmpf ogt, %21, %22 : vector<8x8xf32>
    %cst_19 = arith.constant -1.000000e+04 : f32
    %24 = vector.broadcast %cst_19 : f32 to vector<8x8xf32>
    %25 = arith.select %23, %8, %24 : vector<8x8xi1>, vector<8x8xf32>
    %cst_20 = arith.constant dense<0xFF800000> : vector<8xf32>
    %26 = vector.multi_reduction <maximumf>, %25, %cst_20 [1] : vector<8x8xf32> to vector<8xf32>
    %27 = vector.shape_cast %26 : vector<8xf32> to vector<8x1xf32>
    %28 = vector.broadcast %27 : vector<8x1xf32> to vector<8x8xf32>
    %29 = arith.subf %25, %28 : vector<8x8xf32>
    %30 = math.exp %29 : vector<8x8xf32>
    %cst_21 = arith.constant dense<0.000000e+00> : vector<8xf32>
    %31 = vector.multi_reduction <add>, %30, %cst_21 [1] : vector<8x8xf32> to vector<8xf32>
    %32 = vector.shape_cast %31 : vector<8xf32> to vector<8x1xf32>
    %33 = tpu.reciprocal %32 {approx = true} : vector<8x1xf32> -> vector<8x1xf32>
    %34 = vector.broadcast %33 : vector<8x1xf32> to vector<8x8xf32>
    %35 = arith.mulf %30, %34 : vector<8x8xf32>
    %36 = arith.truncf %35 : vector<8x8xf32> to vector<8x8xbf16>
    %cst_22 = arith.constant dense<0.000000e+00> : vector<8x8xf32>
    %37 = tpu.matmul %36, %7, %cst_22 {dimension_numbers = #tpu.dot_dimension_numbers<[1], [0], [0], [1], [0, 0, 1, 1], [], []>} : vector<8x8xbf16>, vector<8x8xbf16>, vector<8x8xf32> -> vector<8x8xf32>
    %38 = arith.truncf %37 : vector<8x8xf32> to vector<8x8xbf16>
    %c0_23 = arith.constant 0 : index
    %c0_24 = arith.constant 0 : index
    %c0_25 = arith.constant 0 : index
    %c0_26 = arith.constant 0 : index
    %39 = vector.load %arg7[%c0_23, %c0_24, %c0_25, %c0_26] : memref<1x1x8x8xbf16, #tpu.memory_space<vmem>>, vector<1x1x8x8xbf16>
    %40 = vector.shape_cast %39 : vector<1x1x8x8xbf16> to vector<8x8xbf16>
    %41 = vector.shape_cast %38 : vector<8x8xbf16> to vector<1x1x8x8xbf16>
    tpu.vector_store %arg7[%c0_23, %c0_24, %c0_25, %c0_26], %41 {strides = array<i32>} : memref<1x1x8x8xbf16, #tpu.memory_space<vmem>>, vector<1x1x8x8xbf16>,
    return
  }
  func.func @transform_0(%arg0: i32, %arg1: i32) -> (i32, i32, i32, i32) {
    %c0_i32 = arith.constant 0 : i32
    %c0_i32_0 = arith.constant 0 : i32
    %c0_i32_1 = arith.constant 0 : i32
    return %arg0, %arg1, %c0_i32, %c0_i32_0 : i32, i32, i32, i32
  }
  func.func @transform_1(%arg0: i32, %arg1: i32) -> (i32, i32, i32, i32) {
    %c0_i32 = arith.constant 0 : i32
    %c0_i32_0 = arith.constant 0 : i32
    %c0_i32_1 = arith.constant 0 : i32
    return %arg0, %arg1, %c0_i32, %c0_i32_0 : i32, i32, i32, i32
  }
  func.func @transform_2(%arg0: i32, %arg1: i32) -> (i32, i32, i32, i32) {
    %c0_i32 = arith.constant 0 : i32
    %c0_i32_0 = arith.constant 0 : i32
    %c0_i32_1 = arith.constant 0 : i32
    return %arg0, %arg1, %c0_i32, %c0_i32_0 : i32, i32, i32, i32
  }
  func.func @transform_3(%arg0: i32, %arg1: i32) -> (i32, i32, i32) {
    %c0_i32 = arith.constant 0 : i32
    %c0_i32_0 = arith.constant 0 : i32
    %c0_i32_1 = arith.constant 0 : i32
    return %arg0, %c0_i32, %c0_i32_0 : i32, i32, i32
  }
  func.func @transform_4(%arg0: i32, %arg1: i32) -> (i32, i32, i32) {
    %c0_i32 = arith.constant 0 : i32
    %c0_i32_0 = arith.constant 0 : i32
    %c0_i32_1 = arith.constant 0 : i32
    return %arg0, %c0_i32, %c0_i32_0 : i32, i32, i32
  }
  func.func @transform_5(%arg0: i32, %arg1: i32) -> (i32, i32, i32, i32) {
    %c0_i32 = arith.constant 0 : i32
    %c0_i32_0 = arith.constant 0 : i32
    %c0_i32_1 = arith.constant 0 : i32
    return %arg0, %arg1, %c0_i32, %c0_i32_0 : i32, i32, i32, i32
  }
}

module attributes {stable_mosaic.version = 11 : i64} {
  func.func @_mm_bias_kernel(%arg0: i32, %arg1: i32, %arg2: i32, %arg3: memref<16x32xbf16, #tpu.memory_space<vmem>>, %arg4: memref<32x32xbf16, #tpu.memory_space<vmem>>, %arg5: memref<1x32xf32, #tpu.memory_space<vmem>>, %arg6: memref<16x32xbf16, #tpu.memory_space<vmem>>, %arg7: memref<16x32xf32, #tpu.memory_space<vmem>>) attributes {dimension_semantics = [#tpu.dimension_semantics<parallel>, #tpu.dimension_semantics<parallel>, #tpu.dimension_semantics<arbitrary>], iteration_bounds = array<i64: 1, 1, 1>, scalar_prefetch = 0 : i64, scratch_operands = 1 : i64, tpu.core_type = #tpu.core_type<tc>, window_params = [{transform_indices = @transform_0, window_bounds = array<i64: 16, 32>}, {transform_indices = @transform_1, window_bounds = array<i64: 32, 32>}, {transform_indices = @transform_2, window_bounds = array<i64: 1, 32>}, {transform_indices = @transform_3, window_bounds = array<i64: 16, 32>}]} {
    %c0_i32 = arith.constant 0 : i32
    %0 = arith.cmpi eq, %arg2, %c0_i32 : i32
    %1 = arith.extui %0 : i1 to i32
    %c0_i32_0 = arith.constant 0 : i32
    %2 = arith.cmpi ne, %1, %c0_i32_0 : i32
    scf.if %2 {
      %cst_10 = arith.constant 0.000000e+00 : f32
      %12 = vector.broadcast %cst_10 : f32 to vector<16x32xf32>
      %c0_11 = arith.constant 0 : index
      %c0_12 = arith.constant 0 : index
      %13 = vector.load %arg7[%c0_11, %c0_12] : memref<16x32xf32, #tpu.memory_space<vmem>>, vector<16x32xf32>
      tpu.vector_store %arg7[%c0_11, %c0_12], %12 {strides = array<i32>} : memref<16x32xf32, #tpu.memory_space<vmem>>, vector<16x32xf32>,
    } else {
    }
    %c0 = arith.constant 0 : index
    %c0_1 = arith.constant 0 : index
    %3 = vector.load %arg7[%c0, %c0_1] : memref<16x32xf32, #tpu.memory_space<vmem>>, vector<16x32xf32>
    %c0_2 = arith.constant 0 : index
    %c0_3 = arith.constant 0 : index
    %4 = vector.load %arg3[%c0_2, %c0_3] : memref<16x32xbf16, #tpu.memory_space<vmem>>, vector<16x32xbf16>
    %c0_4 = arith.constant 0 : index
    %c0_5 = arith.constant 0 : index
    %5 = vector.load %arg4[%c0_4, %c0_5] : memref<32x32xbf16, #tpu.memory_space<vmem>>, vector<32x32xbf16>
    %cst = arith.constant dense<0.000000e+00> : vector<16x32xf32>
    %6 = tpu.matmul %4, %5, %cst {dimension_numbers = #tpu.dot_dimension_numbers<[1], [0], [0], [1], [0, 0, 1, 1], [], []>} : vector<16x32xbf16>, vector<32x32xbf16>, vector<16x32xf32> -> vector<16x32xf32>
    %7 = arith.addf %3, %6 : vector<16x32xf32>
    %c0_6 = arith.constant 0 : index
    %c0_7 = arith.constant 0 : index
    %8 = vector.load %arg7[%c0_6, %c0_7] : memref<16x32xf32, #tpu.memory_space<vmem>>, vector<16x32xf32>
    tpu.vector_store %arg7[%c0_6, %c0_7], %7 {strides = array<i32>} : memref<16x32xf32, #tpu.memory_space<vmem>>, vector<16x32xf32>,
    %c0_i32_8 = arith.constant 0 : i32
    %9 = arith.cmpi eq, %arg2, %c0_i32_8 : i32
    %10 = arith.extui %9 : i1 to i32
    %c0_i32_9 = arith.constant 0 : i32
    %11 = arith.cmpi ne, %10, %c0_i32_9 : i32
    scf.if %11 {
      %c0_10 = arith.constant 0 : index
      %c0_11 = arith.constant 0 : index
      %12 = vector.load %arg7[%c0_10, %c0_11] : memref<16x32xf32, #tpu.memory_space<vmem>>, vector<16x32xf32>
      %c0_12 = arith.constant 0 : index
      %c0_13 = arith.constant 0 : index
      %13 = vector.load %arg5[%c0_12, %c0_13] : memref<1x32xf32, #tpu.memory_space<vmem>>, vector<1x32xf32>
      %14 = vector.broadcast %13 : vector<1x32xf32> to vector<16x32xf32>
      %15 = arith.addf %12, %14 : vector<16x32xf32>
      %16 = arith.truncf %15 : vector<16x32xf32> to vector<16x32xbf16>
      %c0_14 = arith.constant 0 : index
      %c0_15 = arith.constant 0 : index
      %17 = vector.load %arg6[%c0_14, %c0_15] : memref<16x32xbf16, #tpu.memory_space<vmem>>, vector<16x32xbf16>
      tpu.vector_store %arg6[%c0_14, %c0_15], %16 {strides = array<i32>} : memref<16x32xbf16, #tpu.memory_space<vmem>>, vector<16x32xbf16>,
    } else {
    }
    return
  }
  func.func @transform_0(%arg0: i32, %arg1: i32, %arg2: i32) -> (i32, i32) {
    %c0_i32 = arith.constant 0 : i32
    return %arg0, %arg2 : i32, i32
  }
  func.func @transform_1(%arg0: i32, %arg1: i32, %arg2: i32) -> (i32, i32) {
    %c0_i32 = arith.constant 0 : i32
    return %arg2, %arg1 : i32, i32
  }
  func.func @transform_2(%arg0: i32, %arg1: i32, %arg2: i32) -> (i32, i32) {
    %c0_i32 = arith.constant 0 : i32
    %c0_i32_0 = arith.constant 0 : i32
    return %c0_i32, %arg1 : i32, i32
  }
  func.func @transform_3(%arg0: i32, %arg1: i32, %arg2: i32) -> (i32, i32) {
    %c0_i32 = arith.constant 0 : i32
    return %arg0, %arg1 : i32, i32
  }
}

module attributes {stable_mosaic.version = 11 : i64} {
  func.func @_sdpa_kernel(%arg0: i32, %arg1: i32, %arg2: memref<1x1x8x8xbf16, #tpu.memory_space<vmem>>, %arg3: memref<1x1x8x8xbf16, #tpu.memory_space<vmem>>, %arg4: memref<1x1x8x8xbf16, #tpu.memory_space<vmem>>, %arg5: memref<1x8x1xf32, #tpu.memory_space<vmem>>, %arg6: memref<1x1x8xf32, #tpu.memory_space<vmem>>, %arg7: memref<1x1x8x8xbf16, #tpu.memory_space<vmem>>) attributes {dimension_semantics = [#tpu.dimension_semantics<parallel>, #tpu.dimension_semantics<parallel>], iteration_bounds = array<i64: 2, 4>, scalar_prefetch = 0 : i64, scratch_operands = 0 : i64, tpu.core_type = #tpu.core_type<tc>, window_params = [{transform_indices = @transform_0, window_bounds = array<i64: 1, 1, 8, 8>}, {transform_indices = @transform_1, window_bounds = array<i64: 1, 1, 8, 8>}, {transform_indices = @transform_2, window_bounds = array<i64: 1, 1, 8, 8>}, {transform_indices = @transform_3, window_bounds = array<i64: 1, 8, 1>}, {transform_indices = @transform_4, window_bounds = array<i64: 1, 1, 8>}, {transform_indices = @transform_5, window_bounds = array<i64: 1, 1, 8, 8>}]} {
    %c0 = arith.constant 0 : index
    %c0_0 = arith.constant 0 : index
    %c0_1 = arith.constant 0 : index
    %c0_2 = arith.constant 0 : index
    %0 = vector.load %arg2[%c0, %c0_0, %c0_1, %c0_2] : memref<1x1x8x8xbf16, #tpu.memory_space<vmem>>, vector<1x1x8x8xbf16>
    %1 = vector.shape_cast %0 : vector<1x1x8x8xbf16> to vector<8x8xbf16>
    %cst = arith.constant 3.535160e-01 : bf16
    %2 = vector.broadcast %cst : bf16 to vector<8x8xbf16>
    %3 = arith.mulf %1, %2 : vector<8x8xbf16>
    %c0_3 = arith.constant 0 : index
    %c0_4 = arith.constant 0 : index
    %c0_5 = arith.constant 0 : index
    %c0_6 = arith.constant 0 : index
    %4 = vector.load %arg3[%c0_3, %c0_4, %c0_5, %c0_6] : memref<1x1x8x8xbf16, #tpu.memory_space<vmem>>, vector<1x1x8x8xbf16>
    %5 = vector.shape_cast %4 : vector<1x1x8x8xbf16> to vector<8x8xbf16>
    %c0_7 = arith.constant 0 : index
    %c0_8 = arith.constant 0 : index
    %c0_9 = arith.constant 0 : index
    %c0_10 = arith.constant 0 : index
    %6 = vector.load %arg4[%c0_7, %c0_8, %c0_9, %c0_10] : memref<1x1x8x8xbf16, #tpu.memory_space<vmem>>, vector<1x1x8x8xbf16>
    %7 = vector.shape_cast %6 : vector<1x1x8x8xbf16> to vector<8x8xbf16>
    %cst_11 = arith.constant dense<0.000000e+00> : vector<8x8xf32>
    %8 = tpu.matmul %3, %5, %cst_11 {dimension_numbers = #tpu.dot_dimension_numbers<[1], [1], [0], [0], [0, 0, 1, 0], [], []>} : vector<8x8xbf16>, vector<8x8xbf16>, vector<8x8xf32> -> vector<8x8xf32>
    %c0_12 = arith.constant 0 : index
    %c0_13 = arith.constant 0 : index
    %c0_14 = arith.constant 0 : index
    %9 = vector.load %arg5[%c0_12, %c0_13, %c0_14] : memref<1x8x1xf32, #tpu.memory_space<vmem>>, vector<1x8x1xf32>
    %10 = vector.shape_cast %9 : vector<1x8x1xf32> to vector<8x1xf32>
    %c0_15 = arith.constant 0 : index
    %c0_16 = arith.constant 0 : index
    %c0_17 = arith.constant 0 : index
    %11 = vector.load %arg6[%c0_15, %c0_16, %c0_17] : memref<1x1x8xf32, #tpu.memory_space<vmem>>, vector<1x1x8xf32>
    %12 = vector.shape_cast %11 : vector<1x1x8xf32> to vector<1x8xf32>
    %13 = vector.broadcast %10 : vector<8x1xf32> to vector<8x8xf32>
    %14 = vector.broadcast %12 : vector<1x8xf32> to vector<8x8xf32>
    %15 = arith.mulf %13, %14 : vector<8x8xf32>
    %cst_18 = arith.constant 0.000000e+00 : f32
    %16 = vector.broadcast %cst_18 : f32 to vector<8x8xf32>
    %17 = arith.cmpf ogt, %15, %16 : vector<8x8xf32>
    %cst_19 = arith.constant -1.000000e+04 : f32
    %18 = vector.broadcast %cst_19 : f32 to vector<8x8xf32>
    %19 = arith.select %17, %8, %18 : vector<8x8xi1>, vector<8x8xf32>
    %cst_20 = arith.constant dense<0xFF800000> : vector<8xf32>
    %20 = vector.multi_reduction <maximumf>, %19, %cst_20 [1] : vector<8x8xf32> to vector<8xf32>
    %21 = vector.shape_cast %20 : vector<8xf32> to vector<8x1xf32>
    %22 = vector.broadcast %21 : vector<8x1xf32> to vector<8x8xf32>
    %23 = arith.subf %19, %22 : vector<8x8xf32>
    %24 = math.exp %23 : vector<8x8xf32>
    %cst_21 = arith.constant dense<0.000000e+00> : vector<8xf32>
    %25 = vector.multi_reduction <add>, %24, %cst_21 [1] : vector<8x8xf32> to vector<8xf32>
    %26 = vector.shape_cast %25 : vector<8xf32> to vector<8x1xf32>
    %27 = tpu.reciprocal %26 {approx = true} : vector<8x1xf32> -> vector<8x1xf32>
    %28 = vector.broadcast %27 : vector<8x1xf32> to vector<8x8xf32>
    %29 = arith.mulf %24, %28 : vector<8x8xf32>
    %30 = arith.truncf %29 : vector<8x8xf32> to vector<8x8xbf16>
    %cst_22 = arith.constant dense<0.000000e+00> : vector<8x8xf32>
    %31 = tpu.matmul %30, %7, %cst_22 {dimension_numbers = #tpu.dot_dimension_numbers<[1], [0], [0], [1], [0, 0, 1, 1], [], []>} : vector<8x8xbf16>, vector<8x8xbf16>, vector<8x8xf32> -> vector<8x8xf32>
    %32 = arith.truncf %31 : vector<8x8xf32> to vector<8x8xbf16>
    %c0_23 = arith.constant 0 : index
    %c0_24 = arith.constant 0 : index
    %c0_25 = arith.constant 0 : index
    %c0_26 = arith.constant 0 : index
    %33 = vector.load %arg7[%c0_23, %c0_24, %c0_25, %c0_26] : memref<1x1x8x8xbf16, #tpu.memory_space<vmem>>, vector<1x1x8x8xbf16>
    %34 = vector.shape_cast %33 : vector<1x1x8x8xbf16> to vector<8x8xbf16>
    %35 = vector.shape_cast %32 : vector<8x8xbf16> to vector<1x1x8x8xbf16>
    tpu.vector_store %arg7[%c0_23, %c0_24, %c0_25, %c0_26], %35 {strides = array<i32>} : memref<1x1x8x8xbf16, #tpu.memory_space<vmem>>, vector<1x1x8x8xbf16>,
    return
  }
  func.func @transform_0(%arg0: i32, %arg1: i32) -> (i32, i32, i32, i32) {
    %c0_i32 = arith.constant 0 : i32
    %c0_i32_0 = arith.constant 0 : i32
    %c0_i32_1 = arith.constant 0 : i32
    return %arg0, %arg1, %c0_i32, %c0_i32_0 : i32, i32, i32, i32
  }
  func.func @transform_1(%arg0: i32, %arg1: i32) -> (i32, i32, i32, i32) {
    %c0_i32 = arith.constant 0 : i32
    %c0_i32_0 = arith.constant 0 : i32
    %c0_i32_1 = arith.constant 0 : i32
    return %arg0, %arg1, %c0_i32, %c0_i32_0 : i32, i32, i32, i32
  }
  func.func @transform_2(%arg0: i32, %arg1: i32) -> (i32, i32, i32, i32) {
    %c0_i32 = arith.constant 0 : i32
    %c0_i32_0 = arith.constant 0 : i32
    %c0_i32_1 = arith.constant 0 : i32
    return %arg0, %arg1, %c0_i32, %c0_i32_0 : i32, i32, i32, i32
  }
  func.func @transform_3(%arg0: i32, %arg1: i32) -> (i32, i32, i32) {
    %c0_i32 = arith.constant 0 : i32
    %c0_i32_0 = arith.constant 0 : i32
    %c0_i32_1 = arith.constant 0 : i32
    return %arg0, %c0_i32, %c0_i32_0 : i32, i32, i32
  }
  func.func @transform_4(%arg0: i32, %arg1: i32) -> (i32, i32, i32) {
    %c0_i32 = arith.constant 0 : i32
    %c0_i32_0 = arith.constant 0 : i32
    %c0_i32_1 = arith.constant 0 : i32
    return %arg0, %c0_i32, %c0_i32_0 : i32, i32, i32
  }
  func.func @transform_5(%arg0: i32, %arg1: i32) -> (i32, i32, i32, i32) {
    %c0_i32 = arith.constant 0 : i32
    %c0_i32_0 = arith.constant 0 : i32
    %c0_i32_1 = arith.constant 0 : i32
    return %arg0, %arg1, %c0_i32, %c0_i32_0 : i32, i32, i32, i32
  }
}

module attributes {stable_mosaic.version = 11 : i64} {
  func.func @_mm_bias_kernel(%arg0: i32, %arg1: i32, %arg2: i32, %arg3: memref<16x32xbf16, #tpu.memory_space<vmem>>, %arg4: memref<32x64xbf16, #tpu.memory_space<vmem>>, %arg5: memref<1x64xf32, #tpu.memory_space<vmem>>, %arg6: memref<16x64xbf16, #tpu.memory_space<vmem>>, %arg7: memref<16x64xf32, #tpu.memory_space<vmem>>) attributes {dimension_semantics = [#tpu.dimension_semantics<parallel>, #tpu.dimension_semantics<parallel>, #tpu.dimension_semantics<arbitrary>], iteration_bounds = array<i64: 1, 1, 1>, scalar_prefetch = 0 : i64, scratch_operands = 1 : i64, tpu.core_type = #tpu.core_type<tc>, window_params = [{transform_indices = @transform_0, window_bounds = array<i64: 16, 32>}, {transform_indices = @transform_1, window_bounds = array<i64: 32, 64>}, {transform_indices = @transform_2, window_bounds = array<i64: 1, 64>}, {transform_indices = @transform_3, window_bounds = array<i64: 16, 64>}]} {
    %c0_i32 = arith.constant 0 : i32
    %0 = arith.cmpi eq, %arg2, %c0_i32 : i32
    %1 = arith.extui %0 : i1 to i32
    %c0_i32_0 = arith.constant 0 : i32
    %2 = arith.cmpi ne, %1, %c0_i32_0 : i32
    scf.if %2 {
      %cst_10 = arith.constant 0.000000e+00 : f32
      %12 = vector.broadcast %cst_10 : f32 to vector<16x64xf32>
      %c0_11 = arith.constant 0 : index
      %c0_12 = arith.constant 0 : index
      %13 = vector.load %arg7[%c0_11, %c0_12] : memref<16x64xf32, #tpu.memory_space<vmem>>, vector<16x64xf32>
      tpu.vector_store %arg7[%c0_11, %c0_12], %12 {strides = array<i32>} : memref<16x64xf32, #tpu.memory_space<vmem>>, vector<16x64xf32>,
    } else {
    }
    %c0 = arith.constant 0 : index
    %c0_1 = arith.constant 0 : index
    %3 = vector.load %arg7[%c0, %c0_1] : memref<16x64xf32, #tpu.memory_space<vmem>>, vector<16x64xf32>
    %c0_2 = arith.constant 0 : index
    %c0_3 = arith.constant 0 : index
    %4 = vector.load %arg3[%c0_2, %c0_3] : memref<16x32xbf16, #tpu.memory_space<vmem>>, vector<16x32xbf16>
    %c0_4 = arith.constant 0 : index
    %c0_5 = arith.constant 0 : index
    %5 = vector.load %arg4[%c0_4, %c0_5] : memref<32x64xbf16, #tpu.memory_space<vmem>>, vector<32x64xbf16>
    %cst = arith.constant dense<0.000000e+00> : vector<16x64xf32>
    %6 = tpu.matmul %4, %5, %cst {dimension_numbers = #tpu.dot_dimension_numbers<[1], [0], [0], [1], [0, 0, 1, 1], [], []>} : vector<16x32xbf16>, vector<32x64xbf16>, vector<16x64xf32> -> vector<16x64xf32>
    %7 = arith.addf %3, %6 : vector<16x64xf32>
    %c0_6 = arith.constant 0 : index
    %c0_7 = arith.constant 0 : index
    %8 = vector.load %arg7[%c0_6, %c0_7] : memref<16x64xf32, #tpu.memory_space<vmem>>, vector<16x64xf32>
    tpu.vector_store %arg7[%c0_6, %c0_7], %7 {strides = array<i32>} : memref<16x64xf32, #tpu.memory_space<vmem>>, vector<16x64xf32>,
    %c0_i32_8 = arith.constant 0 : i32
    %9 = arith.cmpi eq, %arg2, %c0_i32_8 : i32
    %10 = arith.extui %9 : i1 to i32
    %c0_i32_9 = arith.constant 0 : i32
    %11 = arith.cmpi ne, %10, %c0_i32_9 : i32
    scf.if %11 {
      %c0_10 = arith.constant 0 : index
      %c0_11 = arith.constant 0 : index
      %12 = vector.load %arg7[%c0_10, %c0_11] : memref<16x64xf32, #tpu.memory_space<vmem>>, vector<16x64xf32>
      %c0_12 = arith.constant 0 : index
      %c0_13 = arith.constant 0 : index
      %13 = vector.load %arg5[%c0_12, %c0_13] : memref<1x64xf32, #tpu.memory_space<vmem>>, vector<1x64xf32>
      %14 = vector.broadcast %13 : vector<1x64xf32> to vector<16x64xf32>
      %15 = arith.addf %12, %14 : vector<16x64xf32>
      %cst_14 = arith.constant 0.000000e+00 : f32
      %16 = vector.broadcast %cst_14 : f32 to vector<16x64xf32>
      %17 = arith.maximumf %15, %16 : vector<16x64xf32>
      %18 = arith.truncf %17 : vector<16x64xf32> to vector<16x64xbf16>
      %c0_15 = arith.constant 0 : index
      %c0_16 = arith.constant 0 : index
      %19 = vector.load %arg6[%c0_15, %c0_16] : memref<16x64xbf16, #tpu.memory_space<vmem>>, vector<16x64xbf16>
      tpu.vector_store %arg6[%c0_15, %c0_16], %18 {strides = array<i32>} : memref<16x64xbf16, #tpu.memory_space<vmem>>, vector<16x64xbf16>,
    } else {
    }
    return
  }
  func.func @transform_0(%arg0: i32, %arg1: i32, %arg2: i32) -> (i32, i32) {
    %c0_i32 = arith.constant 0 : i32
    return %arg0, %arg2 : i32, i32
  }
  func.func @transform_1(%arg0: i32, %arg1: i32, %arg2: i32) -> (i32, i32) {
    %c0_i32 = arith.constant 0 : i32
    return %arg2, %arg1 : i32, i32
  }
  func.func @transform_2(%arg0: i32, %arg1: i32, %arg2: i32) -> (i32, i32) {
    %c0_i32 = arith.constant 0 : i32
    %c0_i32_0 = arith.constant 0 : i32
    return %c0_i32, %arg1 : i32, i32
  }
  func.func @transform_3(%arg0: i32, %arg1: i32, %arg2: i32) -> (i32, i32) {
    %c0_i32 = arith.constant 0 : i32
    return %arg0, %arg1 : i32, i32
  }
}

module attributes {stable_mosaic.version = 11 : i64} {
  func.func @_multi_proj_kernel(%arg0: i32, %arg1: i32, %arg2: memref<16x32xbf16, #tpu.memory_space<vmem>>, %arg3: memref<32x32xbf16, #tpu.memory_space<vmem>>, %arg4: memref<32x32xbf16, #tpu.memory_space<vmem>>, %arg5: memref<1x32xf32, #tpu.memory_space<vmem>>, %arg6: memref<1x32xf32, #tpu.memory_space<vmem>>, %arg7: memref<16x32xbf16, #tpu.memory_space<vmem>>, %arg8: memref<16x32xbf16, #tpu.memory_space<vmem>>, %arg9: memref<16x32xf32, #tpu.memory_space<vmem>>, %arg10: memref<16x32xf32, #tpu.memory_space<vmem>>) attributes {dimension_semantics = [#tpu.dimension_semantics<parallel>, #tpu.dimension_semantics<arbitrary>], iteration_bounds = array<i64: 1, 1>, scalar_prefetch = 0 : i64, scratch_operands = 2 : i64, tpu.core_type = #tpu.core_type<tc>, window_params = [{transform_indices = @transform_0, window_bounds = array<i64: 16, 32>}, {transform_indices = @transform_1, window_bounds = array<i64: 32, 32>}, {transform_indices = @transform_2, window_bounds = array<i64: 32, 32>}, {pipeline_mode = #tpu.pipeline_mode<synchronous>, transform_indices = @transform_3, window_bounds = array<i64: 1, 32>}, {pipeline_mode = #tpu.pipeline_mode<synchronous>, transform_indices = @transform_4, window_bounds = array<i64: 1, 32>}, {transform_indices = @transform_5, window_bounds = array<i64: 16, 32>}, {transform_indices = @transform_6, window_bounds = array<i64: 16, 32>}]} {
    %c0_i32 = arith.constant 0 : i32
    %0 = arith.cmpi eq, %arg1, %c0_i32 : i32
    %1 = arith.extui %0 : i1 to i32
    %c0_i32_0 = arith.constant 0 : i32
    %2 = arith.cmpi ne, %1, %c0_i32_0 : i32
    scf.if %2 {
      %cst_17 = arith.constant 0.000000e+00 : f32
      %17 = vector.broadcast %cst_17 : f32 to vector<16x32xf32>
      %c0_18 = arith.constant 0 : index
      %c0_19 = arith.constant 0 : index
      %18 = vector.load %arg9[%c0_18, %c0_19] : memref<16x32xf32, #tpu.memory_space<vmem>>, vector<16x32xf32>
      tpu.vector_store %arg9[%c0_18, %c0_19], %17 {strides = array<i32>} : memref<16x32xf32, #tpu.memory_space<vmem>>, vector<16x32xf32>,
      %cst_20 = arith.constant 0.000000e+00 : f32
      %19 = vector.broadcast %cst_20 : f32 to vector<16x32xf32>
      %c0_21 = arith.constant 0 : index
      %c0_22 = arith.constant 0 : index
      %20 = vector.load %arg10[%c0_21, %c0_22] : memref<16x32xf32, #tpu.memory_space<vmem>>, vector<16x32xf32>
      tpu.vector_store %arg10[%c0_21, %c0_22], %19 {strides = array<i32>} : memref<16x32xf32, #tpu.memory_space<vmem>>, vector<16x32xf32>,
    } else {
    }
    %c0 = arith.constant 0 : index
    %c0_1 = arith.constant 0 : index
    %3 = vector.load %arg2[%c0, %c0_1] : memref<16x32xbf16, #tpu.memory_space<vmem>>, vector<16x32xbf16>
    %c0_2 = arith.constant 0 : index
    %c0_3 = arith.constant 0 : index
    %4 = vector.load %arg9[%c0_2, %c0_3] : memref<16x32xf32, #tpu.memory_space<vmem>>, vector<16x32xf32>
    %c0_4 = arith.constant 0 : index
    %c0_5 = arith.constant 0 : index
    %5 = vector.load %arg3[%c0_4, %c0_5] : memref<32x32xbf16, #tpu.memory_space<vmem>>, vector<32x32xbf16>
    %cst = arith.constant dense<0.000000e+00> : vector<16x32xf32>
    %6 = tpu.matmul %3, %5, %cst {dimension_numbers = #tpu.dot_dimension_numbers<[1], [0], [0], [1], [0, 0, 1, 1], [], []>} : vector<16x32xbf16>, vector<32x32xbf16>, vector<16x32xf32> -> vector<16x32xf32>
    %7 = arith.addf %4, %6 : vector<16x32xf32>
    %c0_6 = arith.constant 0 : index
    %c0_7 = arith.constant 0 : index
    %8 = vector.load %arg9[%c0_6, %c0_7] : memref<16x32xf32, #tpu.memory_space<vmem>>, vector<16x32xf32>
    tpu.vector_store %arg9[%c0_6, %c0_7], %7 {strides = array<i32>} : memref<16x32xf32, #tpu.memory_space<vmem>>, vector<16x32xf32>,
    %c0_8 = arith.constant 0 : index
    %c0_9 = arith.constant 0 : index
    %9 = vector.load %arg10[%c0_8, %c0_9] : memref<16x32xf32, #tpu.memory_space<vmem>>, vector<16x32xf32>
    %c0_10 = arith.constant 0 : index
    %c0_11 = arith.constant 0 : index
    %10 = vector.load %arg4[%c0_10, %c0_11] : memref<32x32xbf16, #tpu.memory_space<vmem>>, vector<32x32xbf16>
    %cst_12 = arith.constant dense<0.000000e+00> : vector<16x32xf32>
    %11 = tpu.matmul %3, %10, %cst_12 {dimension_numbers = #tpu.dot_dimension_numbers<[1], [0], [0], [1], [0, 0, 1, 1], [], []>} : vector<16x32xbf16>, vector<32x32xbf16>, vector<16x32xf32> -> vector<16x32xf32>
    %12 = arith.addf %9, %11 : vector<16x32xf32>
    %c0_13 = arith.constant 0 : index
    %c0_14 = arith.constant 0 : index
    %13 = vector.load %arg10[%c0_13, %c0_14] : memref<16x32xf32, #tpu.memory_space<vmem>>, vector<16x32xf32>
    tpu.vector_store %arg10[%c0_13, %c0_14], %12 {strides = array<i32>} : memref<16x32xf32, #tpu.memory_space<vmem>>, vector<16x32xf32>,
    %c0_i32_15 = arith.constant 0 : i32
    %14 = arith.cmpi eq, %arg1, %c0_i32_15 : i32
    %15 = arith.extui %14 : i1 to i32
    %c0_i32_16 = arith.constant 0 : i32
    %16 = arith.cmpi ne, %15, %c0_i32_16 : i32
    scf.if %16 {
      %c0_17 = arith.constant 0 : index
      %c0_18 = arith.constant 0 : index
      %17 = vector.load %arg9[%c0_17, %c0_18] : memref<16x32xf32, #tpu.memory_space<vmem>>, vector<16x32xf32>
      %c0_19 = arith.constant 0 : index
      %c0_20 = arith.constant 0 : index
      %18 = vector.load %arg5[%c0_19, %c0_20] : memref<1x32xf32, #tpu.memory_space<vmem>>, vector<1x32xf32>
      %19 = vector.broadcast %18 : vector<1x32xf32> to vector<16x32xf32>
      %20 = arith.addf %17, %19 : vector<16x32xf32>
      %21 = arith.truncf %20 : vector<16x32xf32> to vector<16x32xbf16>
      %c0_21 = arith.constant 0 : index
      %c0_22 = arith.constant 0 : index
      %22 = vector.load %arg7[%c0_21, %c0_22] : memref<16x32xbf16, #tpu.memory_space<vmem>>, vector<16x32xbf16>
      tpu.vector_store %arg7[%c0_21, %c0_22], %21 {strides = array<i32>} : memref<16x32xbf16, #tpu.memory_space<vmem>>, vector<16x32xbf16>,
      %c0_23 = arith.constant 0 : index
      %c0_24 = arith.constant 0 : index
      %23 = vector.load %arg10[%c0_23, %c0_24] : memref<16x32xf32, #tpu.memory_space<vmem>>, vector<16x32xf32>
      %c0_25 = arith.constant 0 : index
      %c0_26 = arith.constant 0 : index
      %24 = vector.load %arg6[%c0_25, %c0_26] : memref<1x32xf32, #tpu.memory_space<vmem>>, vector<1x32xf32>
      %25 = vector.broadcast %24 : vector<1x32xf32> to vector<16x32xf32>
      %26 = arith.addf %23, %25 : vector<16x32xf32>
      %27 = arith.truncf %26 : vector<16x32xf32> to vector<16x32xbf16>
      %c0_27 = arith.constant 0 : index
      %c0_28 = arith.constant 0 : index
      %28 = vector.load %arg8[%c0_27, %c0_28] : memref<16x32xbf16, #tpu.memory_space<vmem>>, vector<16x32xbf16>
      tpu.vector_store %arg8[%c0_27, %c0_28], %27 {strides = array<i32>} : memref<16x32xbf16, #tpu.memory_space<vmem>>, vector<16x32xbf16>,
    } else {
    }
    return
  }
  func.func @transform_0(%arg0: i32, %arg1: i32) -> (i32, i32) {
    %c0_i32 = arith.constant 0 : i32
    return %arg0, %arg1 : i32, i32
  }
  func.func @transform_1(%arg0: i32, %arg1: i32) -> (i32, i32) {
    %c0_i32 = arith.constant 0 : i32
    %c0_i32_0 = arith.constant 0 : i32
    return %arg1, %c0_i32 : i32, i32
  }
  func.func @transform_2(%arg0: i32, %arg1: i32) -> (i32, i32) {
    %c0_i32 = arith.constant 0 : i32
    %c0_i32_0 = arith.constant 0 : i32
    return %arg1, %c0_i32 : i32, i32
  }
  func.func @transform_3(%arg0: i32, %arg1: i32) -> (i32, i32) {
    %c0_i32 = arith.constant 0 : i32
    %c0_i32_0 = arith.constant 0 : i32
    %c0_i32_1 = arith.constant 0 : i32
    return %c0_i32, %c0_i32_0 : i32, i32
  }
  func.func @transform_4(%arg0: i32, %arg1: i32) -> (i32, i32) {
    %c0_i32 = arith.constant 0 : i32
    %c0_i32_0 = arith.constant 0 : i32
    %c0_i32_1 = arith.constant 0 : i32
    return %c0_i32, %c0_i32_0 : i32, i32
  }
  func.func @transform_5(%arg0: i32, %arg1: i32) -> (i32, i32) {
    %c0_i32 = arith.constant 0 : i32
    %c0_i32_0 = arith.constant 0 : i32
    return %arg0, %c0_i32 : i32, i32
  }
  func.func @transform_6(%arg0: i32, %arg1: i32) -> (i32, i32) {
    %c0_i32 = arith.constant 0 : i32
    %c0_i32_0 = arith.constant 0 : i32
    return %arg0, %c0_i32 : i32, i32
  }
}

module attributes {stable_mosaic.version = 11 : i64} {
  func.func @_mm_bias_res_ln_kernel(%arg0: i32, %arg1: i32, %arg2: i32, %arg3: memref<16x64xbf16, #tpu.memory_space<vmem>>, %arg4: memref<64x32xbf16, #tpu.memory_space<vmem>>, %arg5: memref<1x32xf32, #tpu.memory_space<vmem>>, %arg6: memref<16x32xbf16, #tpu.memory_space<vmem>>, %arg7: memref<1x32xf32, #tpu.memory_space<vmem>>, %arg8: memref<1x32xf32, #tpu.memory_space<vmem>>, %arg9: memref<16x32xbf16, #tpu.memory_space<vmem>>, %arg10: memref<16x32xf32, #tpu.memory_space<vmem>>) attributes {dimension_semantics = [#tpu.dimension_semantics<parallel>, #tpu.dimension_semantics<parallel>, #tpu.dimension_semantics<arbitrary>], iteration_bounds = array<i64: 1, 1, 1>, scalar_prefetch = 0 : i64, scratch_operands = 1 : i64, tpu.core_type = #tpu.core_type<tc>, window_params = [{transform_indices = @transform_0, window_bounds = array<i64: 16, 64>}, {transform_indices = @transform_1, window_bounds = array<i64: 64, 32>}, {transform_indices = @transform_2, window_bounds = array<i64: 1, 32>}, {transform_indices = @transform_3, window_bounds = array<i64: 16, 32>}, {transform_indices = @transform_4, window_bounds = array<i64: 1, 32>}, {transform_indices = @transform_5, window_bounds = array<i64: 1, 32>}, {transform_indices = @transform_6, window_bounds = array<i64: 16, 32>}]} {
    %c0_i32 = arith.constant 0 : i32
    %0 = arith.cmpi eq, %arg2, %c0_i32 : i32
    %1 = arith.extui %0 : i1 to i32
    %c0_i32_0 = arith.constant 0 : i32
    %2 = arith.cmpi ne, %1, %c0_i32_0 : i32
    scf.if %2 {
      %cst_10 = arith.constant 0.000000e+00 : f32
      %12 = vector.broadcast %cst_10 : f32 to vector<16x32xf32>
      %c0_11 = arith.constant 0 : index
      %c0_12 = arith.constant 0 : index
      %13 = vector.load %arg10[%c0_11, %c0_12] : memref<16x32xf32, #tpu.memory_space<vmem>>, vector<16x32xf32>
      tpu.vector_store %arg10[%c0_11, %c0_12], %12 {strides = array<i32>} : memref<16x32xf32, #tpu.memory_space<vmem>>, vector<16x32xf32>,
    } else {
    }
    %c0 = arith.constant 0 : index
    %c0_1 = arith.constant 0 : index
    %3 = vector.load %arg10[%c0, %c0_1] : memref<16x32xf32, #tpu.memory_space<vmem>>, vector<16x32xf32>
    %c0_2 = arith.constant 0 : index
    %c0_3 = arith.constant 0 : index
    %4 = vector.load %arg3[%c0_2, %c0_3] : memref<16x64xbf16, #tpu.memory_space<vmem>>, vector<16x64xbf16>
    %c0_4 = arith.constant 0 : index
    %c0_5 = arith.constant 0 : index
    %5 = vector.load %arg4[%c0_4, %c0_5] : memref<64x32xbf16, #tpu.memory_space<vmem>>, vector<64x32xbf16>
    %cst = arith.constant dense<0.000000e+00> : vector<16x32xf32>
    %6 = tpu.matmul %4, %5, %cst {dimension_numbers = #tpu.dot_dimension_numbers<[1], [0], [0], [1], [0, 0, 1, 1], [], []>} : vector<16x64xbf16>, vector<64x32xbf16>, vector<16x32xf32> -> vector<16x32xf32>
    %7 = arith.addf %3, %6 : vector<16x32xf32>
    %c0_6 = arith.constant 0 : index
    %c0_7 = arith.constant 0 : index
    %8 = vector.load %arg10[%c0_6, %c0_7] : memref<16x32xf32, #tpu.memory_space<vmem>>, vector<16x32xf32>
    tpu.vector_store %arg10[%c0_6, %c0_7], %7 {strides = array<i32>} : memref<16x32xf32, #tpu.memory_space<vmem>>, vector<16x32xf32>,
    %c0_i32_8 = arith.constant 0 : i32
    %9 = arith.cmpi eq, %arg2, %c0_i32_8 : i32
    %10 = arith.extui %9 : i1 to i32
    %c0_i32_9 = arith.constant 0 : i32
    %11 = arith.cmpi ne, %10, %c0_i32_9 : i32
    scf.if %11 {
      %c0_10 = arith.constant 0 : index
      %c0_11 = arith.constant 0 : index
      %12 = vector.load %arg10[%c0_10, %c0_11] : memref<16x32xf32, #tpu.memory_space<vmem>>, vector<16x32xf32>
      %c0_12 = arith.constant 0 : index
      %c0_13 = arith.constant 0 : index
      %13 = vector.load %arg5[%c0_12, %c0_13] : memref<1x32xf32, #tpu.memory_space<vmem>>, vector<1x32xf32>
      %14 = vector.broadcast %13 : vector<1x32xf32> to vector<16x32xf32>
      %15 = arith.addf %12, %14 : vector<16x32xf32>
      %c0_14 = arith.constant 0 : index
      %c0_15 = arith.constant 0 : index
      %16 = vector.load %arg6[%c0_14, %c0_15] : memref<16x32xbf16, #tpu.memory_space<vmem>>, vector<16x32xbf16>
      %17 = arith.extf %16 : vector<16x32xbf16> to vector<16x32xf32>
      %18 = arith.addf %15, %17 : vector<16x32xf32>
      %cst_16 = arith.constant dense<0.000000e+00> : vector<16xf32>
      %19 = vector.multi_reduction <add>, %18, %cst_16 [1] : vector<16x32xf32> to vector<16xf32>
      %20 = vector.shape_cast %19 : vector<16xf32> to vector<16x1xf32>
      %cst_17 = arith.constant 3.200000e+01 : f32
      %21 = vector.broadcast %cst_17 : f32 to vector<16x1xf32>
      %22 = arith.divf %20, %21 : vector<16x1xf32>
      %23 = vector.broadcast %22 : vector<16x1xf32> to vector<16x32xf32>
      %24 = arith.subf %18, %23 : vector<16x32xf32>
      %25 = arith.mulf %24, %24 : vector<16x32xf32>
      %cst_18 = arith.constant dense<0.000000e+00> : vector<16xf32>
      %26 = vector.multi_reduction <add>, %25, %cst_18 [1] : vector<16x32xf32> to vector<16xf32>
      %27 = vector.shape_cast %26 : vector<16xf32> to vector<16x1xf32>
      %cst_19 = arith.constant 3.200000e+01 : f32
      %28 = vector.broadcast %cst_19 : f32 to vector<16x1xf32>
      %29 = arith.divf %27, %28 : vector<16x1xf32>
      %30 = vector.broadcast %22 : vector<16x1xf32> to vector<16x32xf32>
      %31 = arith.subf %18, %30 : vector<16x32xf32>
      %cst_20 = arith.constant 9.99999996E-13 : f32
      %32 = vector.broadcast %cst_20 : f32 to vector<16x1xf32>
      %33 = arith.addf %29, %32 : vector<16x1xf32>
      %34 = math.rsqrt %33 : vector<16x1xf32>
      %35 = vector.broadcast %34 : vector<16x1xf32> to vector<16x32xf32>
      %36 = arith.mulf %31, %35 : vector<16x32xf32>
      %c0_21 = arith.constant 0 : index
      %c0_22 = arith.constant 0 : index
      %37 = vector.load %arg7[%c0_21, %c0_22] : memref<1x32xf32, #tpu.memory_space<vmem>>, vector<1x32xf32>
      %38 = vector.broadcast %37 : vector<1x32xf32> to vector<16x32xf32>
      %39 = arith.mulf %36, %38 : vector<16x32xf32>
      %c0_23 = arith.constant 0 : index
      %c0_24 = arith.constant 0 : index
      %40 = vector.load %arg8[%c0_23, %c0_24] : memref<1x32xf32, #tpu.memory_space<vmem>>, vector<1x32xf32>
      %41 = vector.broadcast %40 : vector<1x32xf32> to vector<16x32xf32>
      %42 = arith.addf %39, %41 : vector<16x32xf32>
      %43 = arith.truncf %42 : vector<16x32xf32> to vector<16x32xbf16>
      %c0_25 = arith.constant 0 : index
      %c0_26 = arith.constant 0 : index
      %44 = vector.load %arg9[%c0_25, %c0_26] : memref<16x32xbf16, #tpu.memory_space<vmem>>, vector<16x32xbf16>
      tpu.vector_store %arg9[%c0_25, %c0_26], %43 {strides = array<i32>} : memref<16x32xbf16, #tpu.memory_space<vmem>>, vector<16x32xbf16>,
    } else {
    }
    return
  }
  func.func @transform_0(%arg0: i32, %arg1: i32, %arg2: i32) -> (i32, i32) {
    %c0_i32 = arith.constant 0 : i32
    return %arg0, %arg2 : i32, i32
  }
  func.func @transform_1(%arg0: i32, %arg1: i32, %arg2: i32) -> (i32, i32) {
    %c0_i32 = arith.constant 0 : i32
    return %arg2, %arg1 : i32, i32
  }
  func.func @transform_2(%arg0: i32, %arg1: i32, %arg2: i32) -> (i32, i32) {
    %c0_i32 = arith.constant 0 : i32
    %c0_i32_0 = arith.constant 0 : i32
    return %c0_i32, %arg1 : i32, i32
  }
  func.func @transform_3(%arg0: i32, %arg1: i32, %arg2: i32) -> (i32, i32) {
    %c0_i32 = arith.constant 0 : i32
    return %arg0, %arg1 : i32, i32
  }
  func.func @transform_4(%arg0: i32, %arg1: i32, %arg2: i32) -> (i32, i32) {
    %c0_i32 = arith.constant 0 : i32
    %c0_i32_0 = arith.constant 0 : i32
    return %c0_i32, %arg1 : i32, i32
  }
  func.func @transform_5(%arg0: i32, %arg1: i32, %arg2: i32) -> (i32, i32) {
    %c0_i32 = arith.constant 0 : i32
    %c0_i32_0 = arith.constant 0 : i32
    return %c0_i32, %arg1 : i32, i32
  }
  func.func @transform_6(%arg0: i32, %arg1: i32, %arg2: i32) -> (i32, i32) {
    %c0_i32 = arith.constant 0 : i32
    return %arg0, %arg1 : i32, i32
  }
}

module attributes {stable_mosaic.version = 11 : i64} {
  func.func @_mm_bias_kernel(%arg0: i32, %arg1: i32, %arg2: i32, %arg3: memref<16x32xbf16, #tpu.memory_space<vmem>>, %arg4: memref<32x16xbf16, #tpu.memory_space<vmem>>, %arg5: memref<1x16xf32, #tpu.memory_space<vmem>>, %arg6: memref<16x16xf32, #tpu.memory_space<vmem>>, %arg7: memref<16x16xf32, #tpu.memory_space<vmem>>) attributes {dimension_semantics = [#tpu.dimension_semantics<parallel>, #tpu.dimension_semantics<parallel>, #tpu.dimension_semantics<arbitrary>], iteration_bounds = array<i64: 1, 1, 1>, scalar_prefetch = 0 : i64, scratch_operands = 1 : i64, tpu.core_type = #tpu.core_type<tc>, window_params = [{transform_indices = @transform_0, window_bounds = array<i64: 16, 32>}, {transform_indices = @transform_1, window_bounds = array<i64: 32, 16>}, {transform_indices = @transform_2, window_bounds = array<i64: 1, 16>}, {transform_indices = @transform_3, window_bounds = array<i64: 16, 16>}]} {
    %c0_i32 = arith.constant 0 : i32
    %0 = arith.cmpi eq, %arg2, %c0_i32 : i32
    %1 = arith.extui %0 : i1 to i32
    %c0_i32_0 = arith.constant 0 : i32
    %2 = arith.cmpi ne, %1, %c0_i32_0 : i32
    scf.if %2 {
      %cst_10 = arith.constant 0.000000e+00 : f32
      %12 = vector.broadcast %cst_10 : f32 to vector<16x16xf32>
      %c0_11 = arith.constant 0 : index
      %c0_12 = arith.constant 0 : index
      %13 = vector.load %arg7[%c0_11, %c0_12] : memref<16x16xf32, #tpu.memory_space<vmem>>, vector<16x16xf32>
      tpu.vector_store %arg7[%c0_11, %c0_12], %12 {strides = array<i32>} : memref<16x16xf32, #tpu.memory_space<vmem>>, vector<16x16xf32>,
    } else {
    }
    %c0 = arith.constant 0 : index
    %c0_1 = arith.constant 0 : index
    %3 = vector.load %arg7[%c0, %c0_1] : memref<16x16xf32, #tpu.memory_space<vmem>>, vector<16x16xf32>
    %c0_2 = arith.constant 0 : index
    %c0_3 = arith.constant 0 : index
    %4 = vector.load %arg3[%c0_2, %c0_3] : memref<16x32xbf16, #tpu.memory_space<vmem>>, vector<16x32xbf16>
    %c0_4 = arith.constant 0 : index
    %c0_5 = arith.constant 0 : index
    %5 = vector.load %arg4[%c0_4, %c0_5] : memref<32x16xbf16, #tpu.memory_space<vmem>>, vector<32x16xbf16>
    %cst = arith.constant dense<0.000000e+00> : vector<16x16xf32>
    %6 = tpu.matmul %4, %5, %cst {dimension_numbers = #tpu.dot_dimension_numbers<[1], [0], [0], [1], [0, 0, 1, 1], [], []>} : vector<16x32xbf16>, vector<32x16xbf16>, vector<16x16xf32> -> vector<16x16xf32>
    %7 = arith.addf %3, %6 : vector<16x16xf32>
    %c0_6 = arith.constant 0 : index
    %c0_7 = arith.constant 0 : index
    %8 = vector.load %arg7[%c0_6, %c0_7] : memref<16x16xf32, #tpu.memory_space<vmem>>, vector<16x16xf32>
    tpu.vector_store %arg7[%c0_6, %c0_7], %7 {strides = array<i32>} : memref<16x16xf32, #tpu.memory_space<vmem>>, vector<16x16xf32>,
    %c0_i32_8 = arith.constant 0 : i32
    %9 = arith.cmpi eq, %arg2, %c0_i32_8 : i32
    %10 = arith.extui %9 : i1 to i32
    %c0_i32_9 = arith.constant 0 : i32
    %11 = arith.cmpi ne, %10, %c0_i32_9 : i32
    scf.if %11 {
      %c0_10 = arith.constant 0 : index
      %c0_11 = arith.constant 0 : index
      %12 = vector.load %arg7[%c0_10, %c0_11] : memref<16x16xf32, #tpu.memory_space<vmem>>, vector<16x16xf32>
      %c0_12 = arith.constant 0 : index
      %c0_13 = arith.constant 0 : index
      %13 = vector.load %arg5[%c0_12, %c0_13] : memref<1x16xf32, #tpu.memory_space<vmem>>, vector<1x16xf32>
      %14 = vector.broadcast %13 : vector<1x16xf32> to vector<16x16xf32>
      %15 = arith.addf %12, %14 : vector<16x16xf32>
      %c0_14 = arith.constant 0 : index
      %c0_15 = arith.constant 0 : index
      %16 = vector.load %arg6[%c0_14, %c0_15] : memref<16x16xf32, #tpu.memory_space<vmem>>, vector<16x16xf32>
      tpu.vector_store %arg6[%c0_14, %c0_15], %15 {strides = array<i32>} : memref<16x16xf32, #tpu.memory_space<vmem>>, vector<16x16xf32>,
    } else {
    }
    return
  }
  func.func @transform_0(%arg0: i32, %arg1: i32, %arg2: i32) -> (i32, i32) {
    %c0_i32 = arith.constant 0 : i32
    return %arg0, %arg2 : i32, i32
  }
  func.func @transform_1(%arg0: i32, %arg1: i32, %arg2: i32) -> (i32, i32) {
    %c0_i32 = arith.constant 0 : i32
    return %arg2, %arg1 : i32, i32
  }
  func.func @transform_2(%arg0: i32, %arg1: i32, %arg2: i32) -> (i32, i32) {
    %c0_i32 = arith.constant 0 : i32
    %c0_i32_0 = arith.constant 0 : i32
    return %c0_i32, %arg1 : i32, i32
  }
  func.func @transform_3(%arg0: i32, %arg1: i32, %arg2: i32) -> (i32, i32) {
    %c0_i32 = arith.constant 0 : i32
    return %arg0, %arg1 : i32, i32
  }
}

</mosaic_0001>

<bundles_post_ra>
// kernel: _lambda_.41
= control target key start
LH: loop header
LB: loop body
LE: loop exit
PB: predicated region body
PF: predicated region fallthrough
CT: control target
= control target key end

     0   :  { %vm28_vm0 = vcmask 261120   ;;  %v220_v0 = vmov 0.0   ;;  %vm221_vm1 = vmmov 0   ;;  %vm178_vm2 = vcmask 257024   ;;  %s293_s1 = inlined_call_operand.vmem [shape: bf16[32,32], index: 1, kind: input, shape index: {}]   ;;  %s294_s0 = inlined_call_operand.vmem [shape: bf16[16,32], index: 0, kind: input, shape index: {}]   ;;  %s295_s3 = inlined_call_operand.vmem [shape: bf16[16,32], index: 3, kind: input, shape index: {}]   ;;  %s296_s2 = inlined_call_operand.vmem [shape: f32[1,32], index: 2, kind: input, shape index: {}, may-alias: {2,5}]   ;;  %s297_s4 = inlined_call_operand.vmem [shape: f32[1,32], index: 4, kind: input, shape index: {}]   ;;  %s298_s5 = inlined_call_operand.vmem [shape: f32[1,32], index: 5, kind: input, shape index: {}, may-alias: {2,5}]   ;;  %s299_s6 = inlined_call_operand.vmem [shape: bf16[16,32], index: 6, kind: output, shape index: {}]  }
   0x1   :  { %203 = vmatprep.subr.bf16.mxu0 %v220_v0  ;;  %v213_v1 = vld [vmem:[%s293_s1] sm:$0xff]   ;;  %207 = vmatprep.mubr.msk.bf16.mxu0 %vm221_vm1, %v220_v0  ;;  %29 = vst.msk [vmem:[#allocation2] sm:$0xff] %vm28_vm0, %v220_v0  ;;  %30 = vst.msk [vmem:[#allocation2 + $0x8] sm:$0xff] %vm28_vm0, %v220_v0  ;;  %v214_v2 = vld [vmem:[%s293_s1 + $0x8] sm:$0xff]  }
   0x2   :  { %204 = vmatpush3.bf16.msra.mxu0 %v213_v1  ;;  %v215_v3 = vld [vmem:[%s294_s0] sm:$0xff]  }
   0x3   :  { %205 = vmatprep.subr.bf16.mxu0 %v220_v0  ;;  %v197_v12 = vld [vmem:[%s295_s3] sm:$0xff]  }
   0x4   :  { %v189_v13 = vld [vmem:[%s296_s2] ss:$0 sm:$0xff]  ;;  %v198_v14 = vunpack.c.l.bf16 %v197_v12  ;;  %v199_v17 = vunpack.c.h.bf16 %v197_v12 }
   0x5   :  { %v190_v41 = vld [vmem:[%s297_s4] ss:$0 sm:$0xff] }
   0x6   :  { %206 = vmatpush3.bf16.msra.mxu0 %v214_v2  ;;  %v191_v43 = vld [vmem:[%s298_s5] ss:$0 sm:$0xff] }
   0x8   :  { %v31_v4 = vld [vmem:[#allocation2] sm:$0xff]  ;;  %v32_v6 = vld [vmem:[#allocation2 + $0x8] sm:$0xff] }
   0x9   :  { %208 = vmatmul.mubr.msk.bf16.vlgmr.msra.gmra.mrb[0].mxu0 %vm28_vm0, %v215_v3 }
  0xdc   :  { %v94_v5 = vpop.f32.mrb[0].mxu0 }
  0xdd   :  { %v101_v7 = vadd.f32 %v94_v5, %v31_v4  ;;  %v209_v8 = vpop.f32.mrb[1].mxu0 }
  0xde   :  { %v97_v9 = vpop.f32.mrb[2].mxu0 }
  0xdf   :  { %103 = vst.msk [vmem:[#allocation2] sm:$0xff] %vm28_vm0, %v101_v7  ;;  %v102_v10 = vadd.f32 %v97_v9, %v32_v6  ;;  %v210_v11 = vpop.f32.mrb[3].mxu0 }
  0xe1   :  { %104 = vst.msk [vmem:[#allocation2 + $0x8] sm:$0xff] %vm28_vm0, %v102_v10 }
  0xe6   :  { %v108_v15 = vld [vmem:[#allocation2] sm:$0xff] }
  0xe7   :  { %v117_v16 = vadd.f32 %v189_v13, %v108_v15 }
  0xe8   :  { %v109_v18 = vld [vmem:[#allocation2 + $0x8] sm:$0xff] }
  0xe9   :  { %v123_v19 = vadd.f32 %v198_v14, %v117_v16  ;;  %v118_v20 = vadd.f32 %v189_v13, %v109_v18 }
  0xeb   :  { %v125_v21 = vsel %vm28_vm0, %v123_v19, 0.0  ;;  %v124_v22 = vadd.f32 %v199_v17, %v118_v20 }
  0xec   :  { %126 = vadd.xlane.f32.xlu0 %v125_v21 }
  0xed   :  { %v128_v23 = vsel %vm28_vm0, %v124_v22, 0.0 }
  0xf0   :  { %129 = vadd.xlane.f32.xlu0 %v128_v23 }
 0x179   :  { %v127_v24 = vpop.xlane.xlu0 %126 }
 0x17a   :  { %v132_v25 = vmul.f32 0.03125, %v127_v24 }
 0x17c   :  { %v134_v26 = vsub.f32 %v123_v19, %v132_v25 }
 0x17d   :  { %v130_v27 = vpop.xlane.xlu0 %129 }
 0x17e   :  { %v133_v28 = vmul.f32 0.03125, %v130_v27  ;;  %v136_v29 = vmul.f32 %v134_v26, %v134_v26 }
 0x180   :  { %v135_v30 = vsub.f32 %v124_v22, %v133_v28  ;;  %v138_v31 = vsel %vm28_vm0, %v136_v29, 0.0 }
 0x181   :  { %139 = vadd.xlane.f32.xlu1 %v138_v31 }
 0x182   :  { %v137_v32 = vmul.f32 %v135_v30, %v135_v30 }
 0x184   :  { %v141_v33 = vsel %vm28_vm0, %v137_v32, 0.0 }
 0x185   :  { %142 = vadd.xlane.f32.xlu1 %v141_v33 }
 0x20e   :  { %v140_v34 = vpop.xlane.xlu1 %139 }
 0x20f   :  { %v144_v35 = vmul.f32 0.03125, %v140_v34 }
 0x211   :  { %v146_v36 = vadd.f32 1e-12, %v144_v35 }
 0x212   :  { %v143_v37 = vpop.xlane.xlu1 %142 }
 0x213   :  { %216 = vrsqrt.f32 %v146_v36  ;;  %v145_v38 = vmul.f32 0.03125, %v143_v37 }
 0x215   :  { %v147_v39 = vadd.f32 1e-12, %v145_v38 }
 0x217   :  { %218 = vrsqrt.f32 %v147_v39 }
 0x21d   :  { %v217_v40 = vpop.eup %216 }
 0x21e   :  { %v150_v42 = vmul.f32 %v217_v40, %v134_v26 }
 0x220   :  { %v159_v44 = vmul.f32 %v190_v41, %v150_v42 }
 0x221   :  { %v219_v45 = vpop.eup %218 }
 0x222   :  { %v168_v46 = vadd.f32 %v191_v43, %v159_v44  ;;  %v151_v47 = vmul.f32 %v219_v45, %v135_v30 }
 0x224   :  { %v194_v48 = vpack.c.bf16 %v168_v46, %v168_v46  ;;  %v160_v49 = vmul.f32 %v190_v41, %v151_v47 }
 0x226   :  { %179 = vst.msk [vmem:[%s299_s6] sm:$0xf] %vm178_vm2, %v194_v48  ;;  %v169_v50 = vadd.f32 %v191_v43, %v160_v49 }
 0x228   :  { %v195_v51 = vpack.c.bf16 %v169_v50, %v169_v50 }
 0x22a   :  { %180 = vst.msk [vmem:[%s299_s6 + $0x4] sm:$0xf] %vm178_vm2, %v195_v51 }

// kernel: _lambda_.42
= control target key start
LH: loop header
LB: loop body
LE: loop exit
PB: predicated region body
PF: predicated region fallthrough
CT: control target
= control target key end

     0   :  { %vm19_vm0 = vcmask 261120   ;;  %v150_v0 = vmov 0.0   ;;  %vm151_vm1 = vmmov 0   ;;  %vm118_vm2 = vcmask 257024   ;;  %s195_s1 = inlined_call_operand.vmem [shape: bf16[32,32], index: 1, kind: input, shape index: {}]   ;;  %s196_s0 = inlined_call_operand.vmem [shape: bf16[16,32], index: 0, kind: input, shape index: {}]   ;;  %s197_s2 = inlined_call_operand.vmem [shape: f32[1,32], index: 2, kind: input, shape index: {}]   ;;  %s198_s3 = inlined_call_operand.vmem [shape: bf16[16,32], index: 3, kind: output, shape index: {}]  }
   0x1   :  { %137 = vmatprep.subr.bf16.mxu0 %v150_v0  ;;  %v147_v1 = vld [vmem:[%s195_s1] sm:$0xff]   ;;  %141 = vmatprep.mubr.msk.bf16.mxu0 %vm151_vm1, %v150_v0  ;;  %20 = vst.msk [vmem:[#allocation2] sm:$0xff] %vm19_vm0, %v150_v0  ;;  %21 = vst.msk [vmem:[#allocation2 + $0x8] sm:$0xff] %vm19_vm0, %v150_v0  ;;  %v148_v2 = vld [vmem:[%s195_s1 + $0x8] sm:$0xff]  }
   0x2   :  { %138 = vmatpush3.bf16.msra.mxu0 %v147_v1  ;;  %v149_v3 = vld [vmem:[%s196_s0] sm:$0xff]  }
   0x3   :  { %139 = vmatprep.subr.bf16.mxu0 %v150_v0  ;;  %v129_v12 = vld [vmem:[%s197_s2] ss:$0 sm:$0xff] }
   0x6   :  { %140 = vmatpush3.bf16.msra.mxu0 %v148_v2 }
   0x8   :  { %v22_v4 = vld [vmem:[#allocation2] sm:$0xff]  ;;  %v23_v6 = vld [vmem:[#allocation2 + $0x8] sm:$0xff] }
   0x9   :  { %142 = vmatmul.mubr.msk.bf16.vlgmr.msra.gmra.mrb[0].mxu0 %vm19_vm0, %v149_v3 }
  0xdc   :  { %v85_v5 = vpop.f32.mrb[0].mxu0 }
  0xdd   :  { %v92_v7 = vadd.f32 %v85_v5, %v22_v4  ;;  %v143_v8 = vpop.f32.mrb[1].mxu0 }
  0xde   :  { %v88_v9 = vpop.f32.mrb[2].mxu0 }
  0xdf   :  { %94 = vst.msk [vmem:[#allocation2] sm:$0xff] %vm19_vm0, %v92_v7  ;;  %v93_v10 = vadd.f32 %v88_v9, %v23_v6  ;;  %v144_v11 = vpop.f32.mrb[3].mxu0 }
  0xe1   :  { %95 = vst.msk [vmem:[#allocation2 + $0x8] sm:$0xff] %vm19_vm0, %v93_v10 }
  0xe6   :  { %v99_v13 = vld [vmem:[#allocation2] sm:$0xff] }
  0xe7   :  { %v108_v14 = vadd.f32 %v129_v12, %v99_v13 }
  0xe8   :  { %v100_v15 = vld [vmem:[#allocation2 + $0x8] sm:$0xff] }
  0xe9   :  { %v132_v16 = vpack.c.bf16 %v108_v14, %v108_v14  ;;  %v109_v17 = vadd.f32 %v129_v12, %v100_v15 }
  0xeb   :  { %119 = vst.msk [vmem:[%s198_s3] sm:$0xf] %vm118_vm2, %v132_v16  ;;  %v133_v18 = vpack.c.bf16 %v109_v17, %v109_v17 }
  0xed   :  { %120 = vst.msk [vmem:[%s198_s3 + $0x4] sm:$0xf] %vm118_vm2, %v133_v18 }

// kernel: _lambda_.40
= control target key start
LH: loop header
LB: loop body
LE: loop exit
PB: predicated region body
PF: predicated region fallthrough
CT: control target
= control target key end

     0   :  { %s788_s18 = smov 0   ;;  %s790_s19 = smov 0   ;;  %s862_s0 = inlined_call_operand.vmem [shape: bf16[2,4,8,8], index: 0, kind: input, shape index: {}]   ;;  %s863_s1 = inlined_call_operand.vmem [shape: bf16[2,4,8,8], index: 1, kind: input, shape index: {}]   ;;  %s864_s2 = inlined_call_operand.vmem [shape: bf16[2,4,8,8], index: 2, kind: input, shape index: {}]   ;;  %s865_s3 = inlined_call_operand.vmem [shape: f32[2,8,1], index: 3, kind: input, shape index: {}]   ;;  %s866_s4 = inlined_call_operand.vmem [shape: f32[2,1,8], index: 4, kind: input, shape index: {}]   ;;  %s867_s5 = inlined_call_operand.vmem [shape: bf16[2,4,8,8], index: 5, kind: output, shape index: {}]  }
   0x1   :  { %s792_s20 = smov 0   ;;  %s794_s21 = smov 0  }
   0x2   :  { %s796_s22 = smov 0  }
   0x3 LB: > { %s24_s23 = sadd.s32 1, %s745_s20  ;;  %s27_s24 = sadd.s32 1, %s749_s21  ;;  %s753_s22 = sphi %s796_s22, %s15_s22   ;;  %s749_s21 = sphi %s794_s21, %s871_s21   ;;  %s745_s20 = sphi %s792_s20, %s870_s20   ;;  %s741_s19 = sphi %s790_s19, %s869_s19   ;;  %s737_s18 = sphi %s788_s18, %s868_s18  }
   0x4   : > { %p25_p0 = scmp.ge.s32.totalorder %s24_s23, 4  ;;  %p635_p1 = scmp.ge.s32.totalorder %s753_s22, 1 }
   0x5   : > { %p253_p2 = scmp.lt.s32.totalorder %s753_s22, 9 }
   0x6   : > { %s873_s23 = smov (%p25_p0, %s24_s23), 0  ;;  %s875_s24 = smov (!%p25_p0, %s27_s24), %s749_s21 }
   0x7   : > { %p254_p3 = pnand %p635_p1, %p253_p2  ;;  %p29_p4 = scmp.ge.s32.totalorder %s875_s24, 2 }
   0x8   : > { %p310_p5 = scmp.lt.s32.totalorder (!%p254_p3), %s741_s19, 1  ;;  %p312_p6 = scmp.lt.s32.totalorder (!%p254_p3), %s737_s18, 3  ;;  %v755_v0 = vmov (!%p254_p3), 0.0   ;;  %vm756_vm0 = vmmov (!%p254_p3), 0   ;;  %v757_v1 = vmov (!%p254_p3), 0   ;;  %vm355_vm1 = vcmask (!%p254_p3), 64512  }
   0x9   : > { %s877_s24 = smov (%p29_p4, %s875_s24), 0  ;;  %257 = sbr.rel (%p254_p3) target bundleno = 774 (0x306), region = 40 }
   0xa   : > { %655 = vmatprep.subr.bf16.mxu0 (!%p254_p3), %v755_v0  ;;  %657 = vmatprep.mubr.msk.bf16.mxu0 (!%p254_p3), %vm756_vm0, %v755_v0  ;;  %v416_v7 = vlaneseq (!%p254_p3)  ;;  %vm441_vm4 = vcmask (!%p254_p3), 1043456   ;;  %vm486_vm5 = vcmask (!%p254_p3), 60416  }
   0xb   : > { %710 = vset.pattern.permute.xlu0 (!%p254_p3), %v757_v1  ;;  %661 = vmatprep.subr.bf16.mxu1 (!%p254_p3), %v755_v0 }
   0xc   : > { %663 = vmatprep.mubr.msk.bf16.mxu1 (!%p254_p3), %vm756_vm0, %v755_v0  ;;  %v417_v8 = vshrl.u32 (!%p254_p3), %v416_v7, 7  ;;  %v419_v9 = vand.u32 (!%p254_p3), 127, %v416_v7 }
   0xe   : > { %vm420_vm2 = vcmp.ge.s32.totalorder (!%p254_p3), %v417_v8, %v419_v9 }
   0xf   : > { %v647_v13 = vsel (!%p254_p3), %vm420_vm2, 1.0, %v755_v0 }
  0x10   : > { %s879_s19 = smov (!%p310_p5, %s741_s19), 1  ;;  %s881_s18 = smov (!%p312_p6, %s737_s18), 3 }
  0x11   : > { %s636_s25 = sshll.u32 %s879_s19, 2  ;;  %s642_s26 = sshll.u32 %s879_s19, 3 }
  0x12   : > { %s315_s27 = sadd.s32 %s636_s25, %s881_s18  ;;  %s337_s30 = scalar_lea.vmem %s865_s3, %s642_s26 }
  0x13   : > { %s821_s6 = sshll.u32 %s315_s27, 2  ;;  %v402_v2 = vld [vmem:[%s337_s30] sm:$0xff]  ;;  %s340_s15 = scalar_lea.vmem %s866_s4, %s879_s19 }
  0x14   : > { %s325_s9 = scalar_lea.vmem %s863_s1, %s821_s6  ;;  %s317_s12 = scalar_lea.vmem %s862_s0, %s821_s6  ;;  %406 = vperm.xlu0 %710, %v402_v2   ;;  %v646_v10 = vld [vmem:[%s340_s15] ss:$0 sm:$0xff] }
  0x15   : > { %v353_v3 = vld [vmem:[%s325_s9] sm:$0xf]  ;;  %s333_s18 = scalar_lea.vmem %s864_s2, %s821_s6  ;;  %s348_s26 = scalar_lea.vmem %s867_s5, %s821_s6 }
  0x16   : > { %v360_v4 = vsel %vm355_vm1, %v353_v3, 0  ;;  %v351_v5 = vld [vmem:[%s317_s12] sm:$0xf] }
  0x17   : > { %656 = vmatpush3.bf16.xpose.msra.mxu0 %v360_v4  ;;  %v352_v6 = vmul.bf16 1052065461, %v351_v5  ;;  %v354_v26 = vld [vmem:[%s333_s18] sm:$0xf] }
  0x18   : > { %v443_v27 = vsel %vm441_vm4, %v354_v26, 0 }
  0x19   : > { %662 = vmatpush3.bf16.msra.mxu1 %v443_v27 }
  0x1e   : > { %658 = vmatmul.mubr.msk.bf16.vlgmr.msra.gmra.mrb[0].mxu0 %vm355_vm1, %v352_v6 }
  0x93   : > { %v407_v11 = vpop.permute.xlu0 %406 }
  0x94   : > { %v415_v12 = vmul.f32 %v646_v10, %v407_v11 }
  0x96   : > { %v423_v14 = vmul.f32 %v647_v13, %v415_v12 }
  0x98   : > { %vm424_vm3 = vcmp.gt.f32.partialorder %v423_v14, 0.0 }
  0xf1   : > { %v396_v15 = vpop.f32.mrb[0].mxu0 }
  0xf2   : > { %v425_v16 = vsel %vm424_vm3, %v396_v15, -10000.0  ;;  %v659_v17 = vpop.f32.mrb[1].mxu0 }
  0xf3   : > { %v399_v18 = vpop.f32.mrb[2].mxu0  ;;  %v426_v19 = vsel %vm355_vm1, %v425_v16, -inf }
  0xf4   : > { %427 = vmax.xlane.f32.xlu0 %v426_v19  ;;  %v660_v20 = vpop.f32.mrb[3].mxu0 }
 0x181   : > { %v428_v21 = vpop.xlane.xlu0 %427 }
 0x182   : > { %v429_v22 = vsub.f32 %v425_v16, %v428_v21 }
 0x184   : > { %v430_v23 = vmul.f32 1.442695, %v429_v22 }
 0x186   : > { %711 = vpow2.f32 %v430_v23 }
 0x190   : > { %v712_v24 = vpop.eup %711 }
 0x191   : > { %v432_v25 = vsel %vm355_vm1, %v712_v24, 0.0 }
 0x192   : > { %433 = vadd.xlane.f32.xlu1 %v432_v25 }
 0x21f   : > { %v434_v28 = vpop.xlane.xlu1 %433 }
 0x220   : > { %713 = vrcp.f32 %v434_v28 }
 0x22a   : > { %v714_v29 = vpop.eup %713 }
 0x22b   : > { %v436_v30 = vmul.f32 %v714_v29, %v712_v24 }
 0x22d   : > { %v437_v31 = vpack.c.bf16 %v436_v30, %v436_v30 }
 0x22f   : > { %664 = vmatmul.mubr.msk.bf16.vlgmr.msra.gmra.mrb[0].mxu1 %vm355_vm1, %v437_v31 }
 0x302   : > { %v479_v32 = vpop.f32.mrb[0].mxu1 }
 0x303   : > { %v485_v33 = vpack.c.bf16 %v479_v32, %v479_v32  ;;  %v665_v34 = vpop.f32.mrb[1].mxu1 }
 0x304   : > { %v482_v35 = vpop.f32.mrb[2].mxu1 }
 0x305   : > { %487 = vst.msk [vmem:[%s348_s26] sm:$0xf] %vm486_vm5, %v485_v33  ;;  %v666_v36 = vpop.f32.mrb[3].mxu1 }
 0x306 PF: > { %s15_s22 = sadd.s32 1, %s753_s22   ;;  %s868_s18 = smov %s745_s20 }
 0x307   : > { %p12_p7 = scmp.ge.s32.totalorder %s15_s22, 10   ;;  %s869_s19 = smov %s749_s21 }
 0x308   : > { %s870_s20 = smov %s873_s23  ;;  %s871_s21 = smov %s877_s24 }
 0x309   :  { %14 = sbr.rel (!%p12_p7) target bundleno = 3 (0x3), region = 82 }

// kernel: _lambda_.39
= control target key start
LH: loop header
LB: loop body
LE: loop exit
PB: predicated region body
PF: predicated region fallthrough
CT: control target
= control target key end

     0   :  { %vm34_vm0 = vcmask 261120   ;;  %v387_v0 = vmov 0.0   ;;  %vm388_vm1 = vmmov 0   ;;  %vm263_vm2 = vcmask 257024   ;;  %s511_s1 = inlined_call_operand.vmem [shape: bf16[32,32], index: 1, kind: input, shape index: {}]   ;;  %s512_s2 = inlined_call_operand.vmem [shape: bf16[32,32], index: 2, kind: input, shape index: {}]   ;;  %s513_s0 = inlined_call_operand.vmem [shape: bf16[16,32], index: 0, kind: input, shape index: {}]   ;;  %s514_s3 = inlined_call_operand.vmem [shape: bf16[32,32], index: 3, kind: input, shape index: {}]   ;;  %s515_s4 = inlined_call_operand.vmem [shape: f32[1,32], index: 4, kind: input, shape index: {}, may-alias: {4,5,6}]   ;;  %s516_s5 = inlined_call_operand.vmem [shape: f32[1,32], index: 5, kind: input, shape index: {}, may-alias: {4,5,6}]   ;;  %s517_s7 = inlined_call_operand.vmem [shape: bf16[16,32], index: 7, kind: output, shape index: {0}]   ;;  %s518_s6 = inlined_call_operand.vmem [shape: f32[1,32], index: 6, kind: input, shape index: {}, may-alias: {4,5,6}]   ;;  %s519_s8 = inlined_call_operand.vmem [shape: bf16[16,32], index: 8, kind: output, shape index: {1}]   ;;  %s520_s9 = inlined_call_operand.vmem [shape: bf16[16,32], index: 9, kind: output, shape index: {2}]  }
   0x1   :  { %354 = vmatprep.subr.bf16.mxu0 %v387_v0  ;;  %v380_v1 = vld [vmem:[%s511_s1] sm:$0xff]   ;;  %362 = vmatprep.subr.bf16.mxu1 %v387_v0  ;;  %35 = vst.msk [vmem:[#allocation2] sm:$0xff] %vm34_vm0, %v387_v0  ;;  %36 = vst.msk [vmem:[#allocation2 + $0x8] sm:$0xff] %vm34_vm0, %v387_v0  ;;  %v381_v2 = vld [vmem:[%s511_s1 + $0x8] sm:$0xff]  }
   0x2   :  { %37 = vst.msk [vmem:[#allocation3] sm:$0xff] %vm34_vm0, %v387_v0  ;;  %38 = vst.msk [vmem:[#allocation3 + $0x8] sm:$0xff] %vm34_vm0, %v387_v0  ;;  %358 = vmatprep.mubr.msk.bf16.mxu0 %vm388_vm1, %v387_v0  ;;  %366 = vmatprep.mubr.msk.bf16.mxu1 %vm388_vm1, %v387_v0  ;;  %v382_v3 = vld [vmem:[%s512_s2] sm:$0xff]   ;;  %v385_v5 = vld [vmem:[%s512_s2 + $0x8] sm:$0xff]  }
   0x3   :  { %39 = vst.msk [vmem:[#allocation4] sm:$0xff] %vm34_vm0, %v387_v0  ;;  %40 = vst.msk [vmem:[#allocation4 + $0x8] sm:$0xff] %vm34_vm0, %v387_v0  ;;  %355 = vmatpush3.bf16.msra.mxu0 %v380_v1  ;;  %363 = vmatpush3.bf16.msra.mxu1 %v382_v3  ;;  %v383_v4 = vld [vmem:[%s513_s0] sm:$0xff]   ;;  %v386_v7 = vld [vmem:[%s514_s3 + $0x8] sm:$0xff]  }
   0x4   :  { %356 = vmatprep.subr.bf16.mxu0 %v387_v0  ;;  %364 = vmatprep.subr.bf16.mxu1 %v387_v0  ;;  %v384_v6 = vld [vmem:[%s514_s3] sm:$0xff]  }
   0x5   :  { %v330_v25 = vld [vmem:[%s515_s4] ss:$0 sm:$0xff] }
   0x6   :  { %v333_v31 = vld [vmem:[%s516_s5] ss:$0 sm:$0xff] }
   0x7   :  { %357 = vmatpush3.bf16.msra.mxu0 %v381_v2  ;;  %365 = vmatpush3.bf16.msra.mxu1 %v385_v5  ;;  %v336_v45 = vld [vmem:[%s518_s6] ss:$0 sm:$0xff] }
   0x8   :  { %370 = vmatprep.subr.bf16.mxu0 %v387_v0  ;;  %v43_v8 = vld [vmem:[#allocation2] sm:$0xff]  ;;  %v44_v10 = vld [vmem:[#allocation2 + $0x8] sm:$0xff] }
   0x9   :  { %v115_v11 = vld [vmem:[#allocation3] sm:$0xff]  ;;  %v116_v16 = vld [vmem:[#allocation3 + $0x8] sm:$0xff] }
   0xa   :  { %359 = vmatmul.mubr.msk.bf16.vlgmr.msra.gmra.mrb[0].mxu0 %vm34_vm0, %v383_v4  ;;  %367 = vmatmul.mubr.msk.bf16.vlgmr.msra.gmra.mrb[0].mxu1 %vm34_vm0, %v383_v4  ;;  %v178_v24 = vld [vmem:[#allocation4] sm:$0xff]  ;;  %v179_v27 = vld [vmem:[#allocation4 + $0x8] sm:$0xff] }
   0xb   :  { %371 = vmatpush3.bf16.msra.mxu0 %v384_v6  ;;  %374 = vmatprep.mubr.msk.bf16.mxu0 %vm388_vm1, %v387_v0 }
   0xc   :  { %372 = vmatprep.subr.bf16.mxu0 %v387_v0 }
   0xf   :  { %373 = vmatpush3.bf16.msra.mxu0 %v386_v7 }
  0x12   :  { %375 = vmatmul.mubr.msk.bf16.vlgmr.msra.gmra.mrb[4].mxu0 %vm34_vm0, %v383_v4 }
  0xdd   :  { %v104_v9 = vpop.f32.mrb[0].mxu0  ;;  %v167_v15 = vpop.f32.mrb[0].mxu1 }
  0xde   :  { %v111_v12 = vadd.f32 %v104_v9, %v43_v8  ;;  %v360_v13 = vpop.f32.mrb[1].mxu0  ;;  %v174_v19 = vadd.f32 %v167_v15, %v115_v11  ;;  %v368_v20 = vpop.f32.mrb[1].mxu1 }
  0xdf   :  { %v107_v14 = vpop.f32.mrb[2].mxu0  ;;  %v170_v21 = vpop.f32.mrb[2].mxu1 }
  0xe0   :  { %113 = vst.msk [vmem:[#allocation2] sm:$0xff] %vm34_vm0, %v111_v12  ;;  %v112_v17 = vadd.f32 %v107_v14, %v44_v10  ;;  %v361_v18 = vpop.f32.mrb[3].mxu0  ;;  %176 = vst.msk [vmem:[#allocation3] sm:$0xff] %vm34_vm0, %v174_v19  ;;  %v175_v22 = vadd.f32 %v170_v21, %v116_v16  ;;  %v369_v23 = vpop.f32.mrb[3].mxu1 }
  0xe2   :  { %114 = vst.msk [vmem:[#allocation2 + $0x8] sm:$0xff] %vm34_vm0, %v112_v17  ;;  %177 = vst.msk [vmem:[#allocation3 + $0x8] sm:$0xff] %vm34_vm0, %v175_v22 }
  0xe5   :  { %v230_v26 = vpop.f32.mrb[4].mxu0 }
  0xe6   :  { %v237_v28 = vadd.f32 %v230_v26, %v178_v24  ;;  %v376_v29 = vpop.f32.mrb[5].mxu0 }
  0xe7   :  { %v244_v30 = vld [vmem:[#allocation2] sm:$0xff]  ;;  %v233_v32 = vpop.f32.mrb[6].mxu0  ;;  %v266_v37 = vld [vmem:[#allocation3] sm:$0xff] }
  0xe8   :  { %v253_v33 = vadd.f32 %v330_v25, %v244_v30  ;;  %239 = vst.msk [vmem:[#allocation4] sm:$0xff] %vm34_vm0, %v237_v28  ;;  %v238_v34 = vadd.f32 %v233_v32, %v179_v27  ;;  %v377_v35 = vpop.f32.mrb[7].mxu0  ;;  %v275_v40 = vadd.f32 %v333_v31, %v266_v37 }
  0xe9   :  { %v245_v36 = vld [vmem:[#allocation2 + $0x8] sm:$0xff]  ;;  %v267_v41 = vld [vmem:[#allocation3 + $0x8] sm:$0xff] }
  0xea   :  { %v339_v38 = vpack.c.bf16 %v253_v33, %v253_v33  ;;  %v254_v39 = vadd.f32 %v330_v25, %v245_v36  ;;  %240 = vst.msk [vmem:[#allocation4 + $0x8] sm:$0xff] %vm34_vm0, %v238_v34  ;;  %v341_v43 = vpack.c.bf16 %v275_v40, %v275_v40  ;;  %v276_v44 = vadd.f32 %v333_v31, %v267_v41 }
  0xec   :  { %264 = vst.msk [vmem:[%s517_s7] sm:$0xf] %vm263_vm2, %v339_v38  ;;  %v340_v42 = vpack.c.bf16 %v254_v39, %v254_v39  ;;  %285 = vst.msk [vmem:[%s519_s8] sm:$0xf] %vm263_vm2, %v341_v43  ;;  %v342_v46 = vpack.c.bf16 %v276_v44, %v276_v44 }
  0xee   :  { %265 = vst.msk [vmem:[%s517_s7 + $0x4] sm:$0xf] %vm263_vm2, %v340_v42  ;;  %286 = vst.msk [vmem:[%s519_s8 + $0x4] sm:$0xf] %vm263_vm2, %v342_v46 }
  0xef   :  { %v287_v47 = vld [vmem:[#allocation4] sm:$0xff] }
  0xf0   :  { %v296_v48 = vadd.f32 %v336_v45, %v287_v47 }
  0xf1   :  { %v288_v49 = vld [vmem:[#allocation4 + $0x8] sm:$0xff] }
  0xf2   :  { %v343_v50 = vpack.c.bf16 %v296_v48, %v296_v48  ;;  %v297_v51 = vadd.f32 %v336_v45, %v288_v49 }
  0xf4   :  { %306 = vst.msk [vmem:[%s520_s9] sm:$0xf] %vm263_vm2, %v343_v50  ;;  %v344_v52 = vpack.c.bf16 %v297_v51, %v297_v51 }
  0xf6   :  { %307 = vst.msk [vmem:[%s520_s9 + $0x4] sm:$0xf] %vm263_vm2, %v344_v52 }

// kernel: _lambda_.30
= control target key start
LH: loop header
LB: loop body
LE: loop exit
PB: predicated region body
PF: predicated region fallthrough
CT: control target
= control target key end

     0   :  { %s779_s18 = smov 0   ;;  %s781_s19 = smov 0   ;;  %s853_s0 = inlined_call_operand.vmem [shape: bf16[2,4,8,8], index: 0, kind: input, shape index: {}]   ;;  %s854_s1 = inlined_call_operand.vmem [shape: bf16[2,4,8,8], index: 1, kind: input, shape index: {}]   ;;  %s855_s2 = inlined_call_operand.vmem [shape: bf16[2,4,8,8], index: 2, kind: input, shape index: {}]   ;;  %s856_s3 = inlined_call_operand.vmem [shape: f32[2,8,1], index: 3, kind: input, shape index: {}]   ;;  %s857_s4 = inlined_call_operand.vmem [shape: f32[2,1,8], index: 4, kind: input, shape index: {}]   ;;  %s858_s5 = inlined_call_operand.vmem [shape: bf16[2,4,8,8], index: 5, kind: output, shape index: {}]  }
   0x1   :  { %s783_s20 = smov 0   ;;  %s785_s21 = smov 0  }
   0x2   :  { %s787_s22 = smov 0  }
   0x3 LB: > { %s24_s23 = sadd.s32 1, %s736_s20  ;;  %s27_s24 = sadd.s32 1, %s740_s21  ;;  %s744_s22 = sphi %s787_s22, %s15_s22   ;;  %s740_s21 = sphi %s785_s21, %s862_s21   ;;  %s736_s20 = sphi %s783_s20, %s861_s20   ;;  %s732_s19 = sphi %s781_s19, %s860_s19   ;;  %s728_s18 = sphi %s779_s18, %s859_s18  }
   0x4   : > { %p25_p0 = scmp.ge.s32.totalorder %s24_s23, 4  ;;  %p627_p1 = scmp.ge.s32.totalorder %s744_s22, 1 }
   0x5   : > { %p253_p2 = scmp.lt.s32.totalorder %s744_s22, 9 }
   0x6   : > { %s864_s23 = smov (%p25_p0, %s24_s23), 0  ;;  %s866_s24 = smov (!%p25_p0, %s27_s24), %s740_s21 }
   0x7   : > { %p254_p3 = pnand %p627_p1, %p253_p2  ;;  %p29_p4 = scmp.ge.s32.totalorder %s866_s24, 2 }
   0x8   : > { %p310_p5 = scmp.lt.s32.totalorder (!%p254_p3), %s732_s19, 1  ;;  %p312_p6 = scmp.lt.s32.totalorder (!%p254_p3), %s728_s18, 3  ;;  %v746_v0 = vmov (!%p254_p3), 0.0   ;;  %vm747_vm0 = vmmov (!%p254_p3), 0   ;;  %v748_v1 = vmov (!%p254_p3), 0   ;;  %vm355_vm1 = vcmask (!%p254_p3), 64512  }
   0x9   : > { %s868_s24 = smov (%p29_p4, %s866_s24), 0  ;;  %257 = sbr.rel (%p254_p3) target bundleno = 774 (0x306), region = 40 }
   0xa   : > { %646 = vmatprep.subr.bf16.mxu0 (!%p254_p3), %v746_v0  ;;  %648 = vmatprep.mubr.msk.bf16.mxu0 (!%p254_p3), %vm747_vm0, %v746_v0  ;;  %vm433_vm3 = vcmask (!%p254_p3), 1043456   ;;  %vm478_vm4 = vcmask (!%p254_p3), 60416  }
   0xb   : > { %701 = vset.pattern.permute.xlu0 (!%p254_p3), %v748_v1  ;;  %652 = vmatprep.subr.bf16.mxu1 (!%p254_p3), %v746_v0 }
   0xc   : > { %654 = vmatprep.mubr.msk.bf16.mxu1 (!%p254_p3), %vm747_vm0, %v746_v0 }
  0x10   : > { %s870_s19 = smov (!%p310_p5, %s732_s19), 1  ;;  %s872_s18 = smov (!%p312_p6, %s728_s18), 3 }
  0x11   : > { %s628_s25 = sshll.u32 %s870_s19, 2  ;;  %s634_s26 = sshll.u32 %s870_s19, 3 }
  0x12   : > { %s315_s27 = sadd.s32 %s628_s25, %s872_s18  ;;  %s337_s30 = scalar_lea.vmem %s856_s3, %s634_s26 }
  0x13   : > { %s812_s6 = sshll.u32 %s315_s27, 2  ;;  %v402_v2 = vld [vmem:[%s337_s30] sm:$0xff]  ;;  %s340_s15 = scalar_lea.vmem %s857_s4, %s870_s19 }
  0x14   : > { %s325_s9 = scalar_lea.vmem %s854_s1, %s812_s6  ;;  %s317_s12 = scalar_lea.vmem %s853_s0, %s812_s6  ;;  %406 = vperm.xlu0 %701, %v402_v2   ;;  %v638_v7 = vld [vmem:[%s340_s15] ss:$0 sm:$0xff] }
  0x15   : > { %v353_v3 = vld [vmem:[%s325_s9] sm:$0xf]  ;;  %s333_s18 = scalar_lea.vmem %s855_s2, %s812_s6  ;;  %s348_s26 = scalar_lea.vmem %s858_s5, %s812_s6 }
  0x16   : > { %v360_v4 = vsel %vm355_vm1, %v353_v3, 0  ;;  %v351_v5 = vld [vmem:[%s317_s12] sm:$0xf] }
  0x17   : > { %647 = vmatpush3.bf16.xpose.msra.mxu0 %v360_v4  ;;  %v352_v6 = vmul.bf16 1052065461, %v351_v5  ;;  %v354_v21 = vld [vmem:[%s333_s18] sm:$0xf] }
  0x18   : > { %v435_v22 = vsel %vm433_vm3, %v354_v21, 0 }
  0x19   : > { %653 = vmatpush3.bf16.msra.mxu1 %v435_v22 }
  0x1e   : > { %649 = vmatmul.mubr.msk.bf16.vlgmr.msra.gmra.mrb[0].mxu0 %vm355_vm1, %v352_v6 }
  0x93   : > { %v407_v8 = vpop.permute.xlu0 %406 }
  0x94   : > { %v415_v9 = vmul.f32 %v638_v7, %v407_v8 }
  0x96   : > { %vm416_vm2 = vcmp.gt.f32.partialorder %v415_v9, 0.0 }
  0xf1   : > { %v396_v10 = vpop.f32.mrb[0].mxu0 }
  0xf2   : > { %v417_v11 = vsel %vm416_vm2, %v396_v10, -10000.0  ;;  %v650_v12 = vpop.f32.mrb[1].mxu0 }
  0xf3   : > { %v399_v13 = vpop.f32.mrb[2].mxu0  ;;  %v418_v14 = vsel %vm355_vm1, %v417_v11, -inf }
  0xf4   : > { %419 = vmax.xlane.f32.xlu0 %v418_v14  ;;  %v651_v15 = vpop.f32.mrb[3].mxu0 }
 0x181   : > { %v420_v16 = vpop.xlane.xlu0 %419 }
 0x182   : > { %v421_v17 = vsub.f32 %v417_v11, %v420_v16 }
 0x184   : > { %v422_v18 = vmul.f32 1.442695, %v421_v17 }
 0x186   : > { %702 = vpow2.f32 %v422_v18 }
 0x190   : > { %v703_v19 = vpop.eup %702 }
 0x191   : > { %v424_v20 = vsel %vm355_vm1, %v703_v19, 0.0 }
 0x192   : > { %425 = vadd.xlane.f32.xlu1 %v424_v20 }
 0x21f   : > { %v426_v23 = vpop.xlane.xlu1 %425 }
 0x220   : > { %704 = vrcp.f32 %v426_v23 }
 0x22a   : > { %v705_v24 = vpop.eup %704 }
 0x22b   : > { %v428_v25 = vmul.f32 %v705_v24, %v703_v19 }
 0x22d   : > { %v429_v26 = vpack.c.bf16 %v428_v25, %v428_v25 }
 0x22f   : > { %655 = vmatmul.mubr.msk.bf16.vlgmr.msra.gmra.mrb[0].mxu1 %vm355_vm1, %v429_v26 }
 0x302   : > { %v471_v27 = vpop.f32.mrb[0].mxu1 }
 0x303   : > { %v477_v28 = vpack.c.bf16 %v471_v27, %v471_v27  ;;  %v656_v29 = vpop.f32.mrb[1].mxu1 }
 0x304   : > { %v474_v30 = vpop.f32.mrb[2].mxu1 }
 0x305   : > { %479 = vst.msk [vmem:[%s348_s26] sm:$0xf] %vm478_vm4, %v477_v28  ;;  %v657_v31 = vpop.f32.mrb[3].mxu1 }
 0x306 PF: > { %s15_s22 = sadd.s32 1, %s744_s22   ;;  %s859_s18 = smov %s736_s20 }
 0x307   : > { %p12_p7 = scmp.ge.s32.totalorder %s15_s22, 10   ;;  %s860_s19 = smov %s740_s21 }
 0x308   : > { %s861_s20 = smov %s864_s23  ;;  %s862_s21 = smov %s868_s24 }
 0x309   :  { %14 = sbr.rel (!%p12_p7) target bundleno = 3 (0x3), region = 82 }

// kernel: _lambda_.32
= control target key start
LH: loop header
LB: loop body
LE: loop exit
PB: predicated region body
PF: predicated region fallthrough
CT: control target
= control target key end

     0   :  { %vm19_vm0 = vcmask 523264   ;;  %v153_v0 = vmov 0.0   ;;  %vm154_vm1 = vmmov 0   ;;  %vm47_vm2 = vcmask 261120   ;;  %s197_s1 = inlined_call_operand.vmem [shape: bf16[32,64], index: 1, kind: input, shape index: {}]   ;;  %s198_s0 = inlined_call_operand.vmem [shape: bf16[16,32], index: 0, kind: input, shape index: {}]   ;;  %s199_s2 = inlined_call_operand.vmem [shape: f32[1,64], index: 2, kind: input, shape index: {}]   ;;  %s200_s3 = inlined_call_operand.vmem [shape: bf16[16,64], index: 3, kind: output, shape index: {}]  }
   0x1   :  { %140 = vmatprep.subr.bf16.mxu0 %v153_v0  ;;  %v150_v1 = vld [vmem:[%s197_s1] sm:$0xff]   ;;  %144 = vmatprep.mubr.msk.bf16.mxu0 %vm154_vm1, %v153_v0  ;;  %20 = vst.msk [vmem:[#allocation2] sm:$0xff] %vm19_vm0, %v153_v0  ;;  %21 = vst.msk [vmem:[#allocation2 + $0x8] sm:$0xff] %vm19_vm0, %v153_v0  ;;  %v151_v2 = vld [vmem:[%s197_s1 + $0x8] sm:$0xff]   ;;  %vm121_vm3 = vcmask 519168  }
   0x2   :  { %141 = vmatpush3.bf16.msra.mxu0 %v150_v1  ;;  %v152_v3 = vld [vmem:[%s198_s0] sm:$0xff]  }
   0x3   :  { %142 = vmatprep.subr.bf16.mxu0 %v153_v0  ;;  %v132_v12 = vld [vmem:[%s199_s2] ss:$0 sm:$0xff] }
   0x6   :  { %143 = vmatpush3.bf16.msra.mxu0 %v151_v2 }
   0x8   :  { %v22_v4 = vld [vmem:[#allocation2] sm:$0xff]  ;;  %v23_v6 = vld [vmem:[#allocation2 + $0x8] sm:$0xff] }
   0x9   :  { %145 = vmatmul.mubr.msk.bf16.vlgmr.msra.gmra.mrb[0].mxu0 %vm47_vm2, %v152_v3 }
  0xdc   :  { %v85_v5 = vpop.f32.mrb[0].mxu0 }
  0xdd   :  { %v92_v7 = vadd.f32 %v85_v5, %v22_v4  ;;  %v146_v8 = vpop.f32.mrb[1].mxu0 }
  0xde   :  { %v88_v9 = vpop.f32.mrb[2].mxu0 }
  0xdf   :  { %95 = vst.msk [vmem:[#allocation2] sm:$0xff] %vm19_vm0, %v92_v7  ;;  %v93_v10 = vadd.f32 %v88_v9, %v23_v6  ;;  %v147_v11 = vpop.f32.mrb[3].mxu0 }
  0xe1   :  { %96 = vst.msk [vmem:[#allocation2 + $0x8] sm:$0xff] %vm19_vm0, %v93_v10 }
  0xe6   :  { %v100_v13 = vld [vmem:[#allocation2] sm:$0xff] }
  0xe7   :  { %v109_v14 = vadd.f32 %v132_v12, %v100_v13 }
  0xe8   :  { %v101_v15 = vld [vmem:[#allocation2 + $0x8] sm:$0xff] }
  0xe9   :  { %v111_v16 = vmax.f32 %v109_v14, 0.0  ;;  %v110_v17 = vadd.f32 %v132_v12, %v101_v15 }
  0xeb   :  { %v135_v18 = vpack.c.bf16 %v111_v16, %v111_v16  ;;  %v112_v19 = vmax.f32 %v110_v17, 0.0 }
  0xed   :  { %122 = vst.msk [vmem:[%s200_s3] sm:$0xf] %vm121_vm3, %v135_v18  ;;  %v136_v20 = vpack.c.bf16 %v112_v19, %v112_v19 }
  0xef   :  { %123 = vst.msk [vmem:[%s200_s3 + $0x4] sm:$0xf] %vm121_vm3, %v136_v20 }

// kernel: _lambda_.43
= control target key start
LH: loop header
LB: loop body
LE: loop exit
PB: predicated region body
PF: predicated region fallthrough
CT: control target
= control target key end

     0   :  { %vm27_vm0 = vcmask 261120   ;;  %v269_v0 = vmov 0.0   ;;  %vm270_vm1 = vmmov 0   ;;  %vm191_vm2 = vcmask 257024   ;;  %s349_s1 = inlined_call_operand.vmem [shape: bf16[32,32], index: 1, kind: input, shape index: {}]   ;;  %s350_s2 = inlined_call_operand.vmem [shape: bf16[32,32], index: 2, kind: input, shape index: {}]   ;;  %s351_s0 = inlined_call_operand.vmem [shape: bf16[16,32], index: 0, kind: input, shape index: {}]   ;;  %s352_s3 = inlined_call_operand.vmem [shape: f32[1,32], index: 3, kind: input, shape index: {}, may-alias: {3,4}]   ;;  %s353_s4 = inlined_call_operand.vmem [shape: f32[1,32], index: 4, kind: input, shape index: {}, may-alias: {3,4}]   ;;  %s354_s5 = inlined_call_operand.vmem [shape: bf16[16,32], index: 5, kind: output, shape index: {0}]   ;;  %s355_s6 = inlined_call_operand.vmem [shape: bf16[16,32], index: 6, kind: output, shape index: {1}]  }
   0x1   :  { %246 = vmatprep.subr.bf16.mxu0 %v269_v0  ;;  %254 = vmatprep.subr.bf16.mxu1 %v269_v0  ;;  %v264_v1 = vld [vmem:[%s349_s1] sm:$0xff]   ;;  %28 = vst.msk [vmem:[#allocation2] sm:$0xff] %vm27_vm0, %v269_v0  ;;  %29 = vst.msk [vmem:[#allocation2 + $0x8] sm:$0xff] %vm27_vm0, %v269_v0  ;;  %v266_v3 = vld [vmem:[%s349_s1 + $0x8] sm:$0xff]  }
   0x2   :  { %30 = vst.msk [vmem:[#allocation3] sm:$0xff] %vm27_vm0, %v269_v0  ;;  %31 = vst.msk [vmem:[#allocation3 + $0x8] sm:$0xff] %vm27_vm0, %v269_v0  ;;  %v265_v2 = vld [vmem:[%s350_s2] sm:$0xff]   ;;  %250 = vmatprep.mubr.msk.bf16.mxu0 %vm270_vm1, %v269_v0  ;;  %258 = vmatprep.mubr.msk.bf16.mxu1 %vm270_vm1, %v269_v0  ;;  %v267_v4 = vld [vmem:[%s350_s2 + $0x8] sm:$0xff]  }
   0x3   :  { %247 = vmatpush3.bf16.msra.mxu0 %v264_v1  ;;  %255 = vmatpush3.bf16.msra.mxu1 %v265_v2  ;;  %v268_v5 = vld [vmem:[%s351_s0] sm:$0xff]  }
   0x4   :  { %248 = vmatprep.subr.bf16.mxu0 %v269_v0  ;;  %256 = vmatprep.subr.bf16.mxu1 %v269_v0  ;;  %v230_v22 = vld [vmem:[%s352_s3] ss:$0 sm:$0xff] }
   0x5   :  { %v233_v23 = vld [vmem:[%s353_s4] ss:$0 sm:$0xff] }
   0x7   :  { %249 = vmatpush3.bf16.msra.mxu0 %v266_v3  ;;  %257 = vmatpush3.bf16.msra.mxu1 %v267_v4 }
   0x8   :  { %v34_v6 = vld [vmem:[#allocation2] sm:$0xff]  ;;  %v35_v9 = vld [vmem:[#allocation2 + $0x8] sm:$0xff] }
   0x9   :  { %v106_v7 = vld [vmem:[#allocation3] sm:$0xff]  ;;  %v107_v13 = vld [vmem:[#allocation3 + $0x8] sm:$0xff] }
   0xa   :  { %251 = vmatmul.mubr.msk.bf16.vlgmr.msra.gmra.mrb[0].mxu0 %vm27_vm0, %v268_v5  ;;  %259 = vmatmul.mubr.msk.bf16.vlgmr.msra.gmra.mrb[0].mxu1 %vm27_vm0, %v268_v5 }
  0xdd   :  { %v95_v8 = vpop.f32.mrb[0].mxu0  ;;  %v158_v11 = vpop.f32.mrb[0].mxu1 }
  0xde   :  { %v102_v10 = vadd.f32 %v95_v8, %v34_v6  ;;  %v252_v12 = vpop.f32.mrb[1].mxu0  ;;  %v165_v14 = vadd.f32 %v158_v11, %v106_v7  ;;  %v260_v15 = vpop.f32.mrb[1].mxu1 }
  0xdf   :  { %v98_v16 = vpop.f32.mrb[2].mxu0  ;;  %v161_v18 = vpop.f32.mrb[2].mxu1 }
  0xe0   :  { %104 = vst.msk [vmem:[#allocation2] sm:$0xff] %vm27_vm0, %v102_v10  ;;  %v103_v17 = vadd.f32 %v98_v16, %v35_v9  ;;  %v253_v19 = vpop.f32.mrb[3].mxu0  ;;  %167 = vst.msk [vmem:[#allocation3] sm:$0xff] %vm27_vm0, %v165_v14  ;;  %v166_v20 = vadd.f32 %v161_v18, %v107_v13  ;;  %v261_v21 = vpop.f32.mrb[3].mxu1 }
  0xe2   :  { %105 = vst.msk [vmem:[#allocation2 + $0x8] sm:$0xff] %vm27_vm0, %v103_v17  ;;  %168 = vst.msk [vmem:[#allocation3 + $0x8] sm:$0xff] %vm27_vm0, %v166_v20 }
  0xe7   :  { %v172_v24 = vld [vmem:[#allocation2] sm:$0xff]  ;;  %v194_v26 = vld [vmem:[#allocation3] sm:$0xff] }
  0xe8   :  { %v181_v25 = vadd.f32 %v230_v22, %v172_v24  ;;  %v203_v27 = vadd.f32 %v233_v23, %v194_v26 }
  0xe9   :  { %v173_v28 = vld [vmem:[#allocation2 + $0x8] sm:$0xff]  ;;  %v195_v31 = vld [vmem:[#allocation3 + $0x8] sm:$0xff] }
  0xea   :  { %v236_v29 = vpack.c.bf16 %v181_v25, %v181_v25  ;;  %v182_v30 = vadd.f32 %v230_v22, %v173_v28  ;;  %v238_v32 = vpack.c.bf16 %v203_v27, %v203_v27  ;;  %v204_v33 = vadd.f32 %v233_v23, %v195_v31 }
  0xec   :  { %192 = vst.msk [vmem:[%s354_s5] sm:$0xf] %vm191_vm2, %v236_v29  ;;  %v237_v34 = vpack.c.bf16 %v182_v30, %v182_v30  ;;  %213 = vst.msk [vmem:[%s355_s6] sm:$0xf] %vm191_vm2, %v238_v32  ;;  %v239_v35 = vpack.c.bf16 %v204_v33, %v204_v33 }
  0xee   :  { %193 = vst.msk [vmem:[%s354_s5 + $0x4] sm:$0xf] %vm191_vm2, %v237_v34  ;;  %214 = vst.msk [vmem:[%s355_s6 + $0x4] sm:$0xf] %vm191_vm2, %v239_v35 }

// kernel: _lambda_.33
= control target key start
LH: loop header
LB: loop body
LE: loop exit
PB: predicated region body
PF: predicated region fallthrough
CT: control target
= control target key end

     0   :  { %vm28_vm0 = vcmask 261120   ;;  %v247_v0 = vmov 0.0   ;;  %vm248_vm1 = vmmov 0   ;;  %vm72_vm2 = vcmask 523264   ;;  %s325_s1 = inlined_call_operand.vmem [shape: bf16[64,32], index: 1, kind: input, shape index: {}]   ;;  %s326_s0 = inlined_call_operand.vmem [shape: bf16[16,64], index: 0, kind: input, shape index: {}]   ;;  %s327_s3 = inlined_call_operand.vmem [shape: bf16[16,32], index: 3, kind: input, shape index: {}]   ;;  %s328_s2 = inlined_call_operand.vmem [shape: f32[1,32], index: 2, kind: input, shape index: {}, may-alias: {2,5}]   ;;  %s329_s4 = inlined_call_operand.vmem [shape: f32[1,32], index: 4, kind: input, shape index: {}]   ;;  %s330_s5 = inlined_call_operand.vmem [shape: f32[1,32], index: 5, kind: input, shape index: {}, may-alias: {2,5}]   ;;  %s331_s6 = inlined_call_operand.vmem [shape: bf16[16,32], index: 6, kind: output, shape index: {}]  }
   0x1   :  { %224 = vmatprep.subr.bf16.mxu0 %v247_v0  ;;  %v238_v1 = vld [vmem:[%s325_s1] sm:$0xff]   ;;  %232 = vmatprep.mubr.msk.bf16.mxu0 %vm248_vm1, %v247_v0  ;;  %29 = vst.msk [vmem:[#allocation2] sm:$0xff] %vm28_vm0, %v247_v0  ;;  %30 = vst.msk [vmem:[#allocation2 + $0x8] sm:$0xff] %vm28_vm0, %v247_v0  ;;  %v239_v2 = vld [vmem:[%s325_s1 + $0x8] sm:$0xff]   ;;  %vm195_vm3 = vcmask 257024  }
   0x2   :  { %225 = vmatpush3.bf16.msra.mxu0 %v238_v1  ;;  %v240_v3 = vld [vmem:[%s325_s1 + $0x10] sm:$0xff]   ;;  %v241_v4 = vld [vmem:[%s325_s1 + $0x18] sm:$0xff]   ;;  %v242_v5 = vld [vmem:[%s326_s0] sm:$0xff]  }
   0x3   :  { %226 = vmatprep.subr.bf16.mxu0 %v247_v0  ;;  %v216_v14 = vld [vmem:[%s327_s3] sm:$0xff]  }
   0x4   :  { %v208_v15 = vld [vmem:[%s328_s2] ss:$0 sm:$0xff]  ;;  %v217_v16 = vunpack.c.l.bf16 %v216_v14  ;;  %v218_v19 = vunpack.c.h.bf16 %v216_v14 }
   0x5   :  { %v209_v43 = vld [vmem:[%s329_s4] ss:$0 sm:$0xff] }
   0x6   :  { %227 = vmatpush3.bf16.msra.mxu0 %v239_v2  ;;  %v210_v45 = vld [vmem:[%s330_s5] ss:$0 sm:$0xff] }
   0x7   :  { %228 = vmatprep.subr.bf16.mxu0 %v247_v0 }
   0x8   :  { %v31_v6 = vld [vmem:[#allocation2] sm:$0xff]  ;;  %v32_v8 = vld [vmem:[#allocation2 + $0x8] sm:$0xff] }
   0xa   :  { %229 = vmatpush3.bf16.msra.mxu0 %v240_v3 }
   0xb   :  { %230 = vmatprep.subr.bf16.mxu0 %v247_v0 }
   0xe   :  { %231 = vmatpush3.bf16.msra.mxu0 %v241_v4 }
  0x11   :  { %233 = vmatmul.mubr.msk.bf16.vlgmr.msra.gmra.mrb[0].mxu0 %vm72_vm2, %v242_v5 }
  0xe4   :  { %v110_v7 = vpop.f32.mrb[0].mxu0 }
  0xe5   :  { %v117_v9 = vadd.f32 %v110_v7, %v31_v6  ;;  %v234_v10 = vpop.f32.mrb[1].mxu0 }
  0xe6   :  { %v113_v11 = vpop.f32.mrb[2].mxu0 }
  0xe7   :  { %120 = vst.msk [vmem:[#allocation2] sm:$0xff] %vm28_vm0, %v117_v9  ;;  %v118_v12 = vadd.f32 %v113_v11, %v32_v8  ;;  %v235_v13 = vpop.f32.mrb[3].mxu0 }
  0xe9   :  { %121 = vst.msk [vmem:[#allocation2 + $0x8] sm:$0xff] %vm28_vm0, %v118_v12 }
  0xee   :  { %v125_v17 = vld [vmem:[#allocation2] sm:$0xff] }
  0xef   :  { %v134_v18 = vadd.f32 %v208_v15, %v125_v17 }
  0xf0   :  { %v126_v20 = vld [vmem:[#allocation2 + $0x8] sm:$0xff] }
  0xf1   :  { %v140_v21 = vadd.f32 %v217_v16, %v134_v18  ;;  %v135_v22 = vadd.f32 %v208_v15, %v126_v20 }
  0xf3   :  { %v142_v23 = vsel %vm28_vm0, %v140_v21, 0.0  ;;  %v141_v24 = vadd.f32 %v218_v19, %v135_v22 }
  0xf4   :  { %143 = vadd.xlane.f32.xlu0 %v142_v23 }
  0xf5   :  { %v145_v25 = vsel %vm28_vm0, %v141_v24, 0.0 }
  0xf8   :  { %146 = vadd.xlane.f32.xlu0 %v145_v25 }
 0x181   :  { %v144_v26 = vpop.xlane.xlu0 %143 }
 0x182   :  { %v149_v27 = vmul.f32 0.03125, %v144_v26 }
 0x184   :  { %v151_v28 = vsub.f32 %v140_v21, %v149_v27 }
 0x185   :  { %v147_v29 = vpop.xlane.xlu0 %146 }
 0x186   :  { %v150_v30 = vmul.f32 0.03125, %v147_v29  ;;  %v153_v31 = vmul.f32 %v151_v28, %v151_v28 }
 0x188   :  { %v152_v32 = vsub.f32 %v141_v24, %v150_v30  ;;  %v155_v33 = vsel %vm28_vm0, %v153_v31, 0.0 }
 0x189   :  { %156 = vadd.xlane.f32.xlu1 %v155_v33 }
 0x18a   :  { %v154_v34 = vmul.f32 %v152_v32, %v152_v32 }
 0x18c   :  { %v158_v35 = vsel %vm28_vm0, %v154_v34, 0.0 }
 0x18d   :  { %159 = vadd.xlane.f32.xlu1 %v158_v35 }
 0x216   :  { %v157_v36 = vpop.xlane.xlu1 %156 }
 0x217   :  { %v161_v37 = vmul.f32 0.03125, %v157_v36 }
 0x219   :  { %v163_v38 = vadd.f32 1e-12, %v161_v37 }
 0x21a   :  { %v160_v39 = vpop.xlane.xlu1 %159 }
 0x21b   :  { %243 = vrsqrt.f32 %v163_v38  ;;  %v162_v40 = vmul.f32 0.03125, %v160_v39 }
 0x21d   :  { %v164_v41 = vadd.f32 1e-12, %v162_v40 }
 0x21f   :  { %245 = vrsqrt.f32 %v164_v41 }
 0x225   :  { %v244_v42 = vpop.eup %243 }
 0x226   :  { %v167_v44 = vmul.f32 %v244_v42, %v151_v28 }
 0x228   :  { %v176_v46 = vmul.f32 %v209_v43, %v167_v44 }
 0x229   :  { %v246_v47 = vpop.eup %245 }
 0x22a   :  { %v185_v48 = vadd.f32 %v210_v45, %v176_v46  ;;  %v168_v49 = vmul.f32 %v246_v47, %v152_v32 }
 0x22c   :  { %v213_v50 = vpack.c.bf16 %v185_v48, %v185_v48  ;;  %v177_v51 = vmul.f32 %v209_v43, %v168_v49 }
 0x22e   :  { %196 = vst.msk [vmem:[%s331_s6] sm:$0xf] %vm195_vm3, %v213_v50  ;;  %v186_v52 = vadd.f32 %v210_v45, %v177_v51 }
 0x230   :  { %v214_v53 = vpack.c.bf16 %v186_v52, %v186_v52 }
 0x232   :  { %197 = vst.msk [vmem:[%s331_s6 + $0x4] sm:$0xf] %vm195_vm3, %v214_v53 }

// kernel: _lambda_.57
= control target key start
LH: loop header
LB: loop body
LE: loop exit
PB: predicated region body
PF: predicated region fallthrough
CT: control target
= control target key end

     0   :  { %v178_v1 = vmov 0.0   ;;  %vm179_vm0 = vmmov 0   ;;  %vm20_vm1 = vcmask 130048   ;;  %s233_s0 = inlined_call_operand.vmem [shape: bf16[16,32], index: 0, kind: input, shape index: {}]   ;;  %s234_s1 = inlined_call_operand.vmem [shape: bf16[32,16], index: 1, kind: input, shape index: {}]   ;;  %s235_s2 = inlined_call_operand.vmem [shape: f32[1,16], index: 2, kind: input, shape index: {}]   ;;  %s236_s3 = inlined_call_operand.hbm [shape: f32[16,16], index: 3, kind: output, shape index: {}]  }
   0x1   :  { %v151_v0 = vld [vmem:[%s234_s1] sm:$0xff]   ;;  %138 = vmatprep.subr.bf16.mxu0 %v178_v1  ;;  %v152_v2 = vld [vmem:[%s234_s1 + $0x8] sm:$0xff]   ;;  %142 = vmatprep.mubr.msk.bf16.mxu0 %vm179_vm0, %v178_v1 }
   0x2   :  { %139 = vmatpush3.bf16.msra.mxu0 %v151_v0 }
   0x3   :  { %140 = vmatprep.subr.bf16.mxu0 %v178_v1 }
   0x4   :  { %8 = vsyncpa [#allocation4], 0  ;;  %21 = vst.msk [vmem:[#allocation2] sm:$0xff] %vm20_vm1, %v178_v1  ;;  %v153_v3 = vld [vmem:[%s233_s0] sm:$0xff]   ;;  %vm48_vm2 = vcmask 261120   ;;  %s180_s0 = smov [#allocation3]  }
   0x5   :  { %22 = vst.msk [vmem:[#allocation2 + $0x8] sm:$0xff] %vm20_vm1, %v178_v1  ;;  %v134_v12 = vld [vmem:[%s235_s2] ss:$0 sm:$0xff]  ;;  %s119_s19 = sshll.u32 %s180_s0, 4  ;;  %s120_s19 = int_to_ptr.vmem [resolvable:$true] %s119_s19 }
   0x6   :  { %141 = vmatpush3.bf16.msra.mxu0 %v152_v2  ;;  %s154_s20 = scalar_lea.vmem %s120_s19, 256  ;;  %p159_p1 = scmp.lt.s32.totalorder %s120_s19, %s120_s19 }
   0x7   :  { %p155_p0 = scmp.ne.s32.totalorder %s120_s19, %s154_s20  ;;  %p160_p2 = scmp.lt.s32.totalorder %s154_s20, %s154_s20 }
   0x9   :  { %143 = vmatmul.mubr.msk.bf16.vlgmr.msra.gmra.mrb[0].mxu0 %vm48_vm2, %v153_v3  ;;  %p161_p3 = por %p160_p2, %p159_p1 }
   0xb   :  { %v23_v4 = vld [vmem:[#allocation2] sm:$0xff]  ;;  %p162_p4 = pnand %p161_p3, %p155_p0 }
   0xc   :  { %v24_v6 = vld [vmem:[#allocation2 + $0x8] sm:$0xff] }
  0xdc   :  { %v86_v5 = vpop.f32.mrb[0].mxu0 }
  0xdd   :  { %v93_v7 = vadd.f32 %v86_v5, %v23_v4  ;;  %v144_v8 = vpop.f32.mrb[1].mxu0 }
  0xde   :  { %v89_v9 = vpop.f32.mrb[2].mxu0 }
  0xdf   :  { %96 = vst.msk [vmem:[#allocation2] sm:$0xff] %vm20_vm1, %v93_v7  ;;  %v94_v10 = vadd.f32 %v89_v9, %v24_v6  ;;  %v145_v11 = vpop.f32.mrb[3].mxu0 }
  0xe1   :  { %97 = vst.msk [vmem:[#allocation2 + $0x8] sm:$0xff] %vm20_vm1, %v94_v10 }
  0xe6   :  { %v101_v13 = vld [vmem:[#allocation2] sm:$0xff] }
  0xe7   :  { %v110_v14 = vadd.f32 %v134_v12, %v101_v13 }
  0xe8   :  { %v102_v15 = vld [vmem:[#allocation2 + $0x8] sm:$0xff] }
  0xe9   :  { %v111_v16 = vadd.f32 %v134_v12, %v102_v15  ;;  %112 = vst.msk [vmem:[#allocation3] sm:$0xff] %vm20_vm1, %v110_v14 }
  0xeb   :  { %113 = vst.msk [vmem:[#allocation3 + $0x8] sm:$0xff] %vm20_vm1, %v111_v16 }
  0xec   :  { %165 = shalt.err (!%p162_p4)
}
  0xed   :  { %s166_s22 = scalar_lea.hbm %s236_s3, 256 }
  0xee   :  { %p167_p5 = scmp.ne.s32.totalorder %s236_s3, %s166_s22  ;;  %p170_p6 = scmp.lt.u32.totalorder %s166_s22, %s236_s3 }
  0xf0   :  { %p172_p7 = pnand %p170_p6, %p167_p5 }
  0xf2   :  { %175 = shalt.err (!%p172_p7)
}
  0xf3   :  { %s181_s27 = smov 128   ;;  %s182_s28 = smov 8  }
  0xf4   :  { %125 = dma.vmem_to_hbm [thread:$0]  %s120_s19, 256, %s236_s3, [#allocation4], %s181_s27, %s181_s27, %s182_s28  }
  0xf5   :  { %176 = dma.done.wait [#allocation4], 256  }
  0xf6   :  { %177 = vsyncadd [#allocation4], 4294967040 }
  0xf7   :  { %129 = vsyncpa [#allocation4], 1 }

</bundles_post_ra>
